<compile_context>
chip_gen: v7x
topology: tpu7x:2x2x1
jax: 0.10.0
libtpu: 0.0.40
codegen_flags: <defaults>
</compile_context>

<pallas_src>
import math

import numpy as np
import jax
import jax.numpy as jnp
from jax import lax
from jax.experimental import pallas as pl
from jax.experimental.pallas import tpu as pltpu

# ---------------- config (consistent with the module's shape arithmetic) ----
DIM = 64                          # ModelConfig.dim (so dim // n_heads // 2 is exact & even)
N_HEADS = 4                       # ModelConfig.n_heads
HEAD_DIM = DIM // N_HEADS // 2    # = 8   (matches: dim // n_heads // 2)
PAIR_DIM = 2 * HEAD_DIM           # = 16  (the two differential sub-heads, contiguous)
SCALE = HEAD_DIM ** -0.5
DEPTH = 1
LAMBDA_INIT = 0.8 - 0.6 * math.exp(-0.3 * DEPTH)
B = 2
S = 16


# ---------------- single fused Pallas kernel (one grid step) ----------------
def fused_diff_attn_kernel(x_ref, w_ref, b_ref, rope_ref, lam_ref, o_ref):
    # x_ref   : (B*S, D)      both batches, batch-major rows
    # w_ref   : (D, 5D)       [Wq | Wk | Wv | Wq@P | Wk@P]   (P = rotary pair swap)
    # b_ref   : (1, 5D)
    # rope_ref: (4, B*S, D)   [cos*scale, sin_signed*scale, cos, sin_signed]
    # lam_ref : (1, 1) SMEM   precomputed differential lambda
    # o_ref   : (S, B*D)      lane-dense output slab (batch packed along lanes)

    # ---- fused QKV (+ pre-permuted Q/K) projection: one N=320 MXU pass -----
    x = x_ref[...]                                                      # (B*S, D)
    qkv = jnp.dot(x, w_ref[...], preferred_element_type=jnp.float32) + b_ref[...]
    q_raw = qkv[:, 0 * DIM:1 * DIM]
    k_raw = qkv[:, 1 * DIM:2 * DIM]
    v     = qkv[:, 2 * DIM:3 * DIM]
    q_sw  = qkv[:, 3 * DIM:4 * DIM]     # == q_raw @ P (swap folded into the weight)
    k_sw  = qkv[:, 4 * DIM:5 * DIM]     # == k_raw @ P

    # ---- RoPE as pure elementwise muls (SCALE pre-folded into Q planes) ----
    #   rot(x)[:, c] = x[:, c] * cos[c] + x[:, c^1] * sin_signed[c]
    q = q_raw * rope_ref[0] + q_sw * rope_ref[1]
    k = k_raw * rope_ref[2] + k_sw * rope_ref[3]

    # ---- differential lambda: parameter-only, precomputed, SMEM scalar ------
    # TODO(synk): reference line `torch.exp(...) - torch.exp * (...)` is a
    # TypeError; the standard DIFF-Transformer scalar lambda is used instead.
    lam = lam_ref[0, 0]

    # ---- causal mask: built once, reused by every batch & head pair --------
    # TODO(synk): reference builds a +inf torch.triu mask (including the
    # diagonal), which would NaN every softmax row; the intended strict
    # upper-triangle causal mask is used instead.
    row = lax.broadcasted_iota(jnp.int32, (S, S), 0)
    col = lax.broadcasted_iota(jnp.int32, (S, S), 1)
    causal = col > row
    neg_inf = jnp.float32(-jnp.inf)

    def masked_softmax(scores):
        scores = jnp.where(causal, neg_inf, scores)
        m = jnp.max(scores, axis=-1, keepdims=True)
        e = jnp.exp(scores - m)
        # approx reciprocal on the EUP (free slot); ~1e-3 rel err, inference-OK.
        return e * pl.reciprocal(jnp.sum(e, axis=-1, keepdims=True), approx=True)

    dn = (((1,), (1,)), ((), ()))   # (S, hd) x (S, hd) -> (S, S)
    outs = []
    for b in range(B):              # static in-kernel batch loop (grid collapsed)
        r0 = b * S
        qb = q[r0:r0 + S, :]
        kb = k[r0:r0 + S, :]
        vb = v[r0:r0 + S, :]
        for h in range(N_HEADS):    # unrolled over the 4 differential head pairs
            c1 = h * PAIR_DIM
            c2 = c1 + HEAD_DIM
            a1 = masked_softmax(lax.dot_general(
                qb[:, c1:c2], kb[:, c1:c2], dn, preferred_element_type=jnp.float32))
            a2 = masked_softmax(lax.dot_general(
                qb[:, c2:c1 + PAIR_DIM], kb[:, c2:c1 + PAIR_DIM], dn,
                preferred_element_type=jnp.float32))
            a = a1 - lam * a2
            # merged attn@V: v1|v2 is one contiguous 16-lane slice
            outs.append(jnp.dot(a, vb[:, c1:c1 + PAIR_DIM],
                                preferred_element_type=jnp.float32))

    # ---- recombine heads & batches in-register; single (16,128) dense store --
    # TODO(synk): reference forward has no return / no attn@V; standard
    # differential attention output (attn1 - lambda*attn2) @ V is produced.
    # TODO(synk): canonical DIFF-Transformer also applies per-head RMSNorm,
    # a (1 - lambda_init) scale and an output projection; the reference is
    # truncated before those, so they are omitted here too.
    o_ref[...] = jnp.concatenate(outs, axis=-1)                     # (S, B*D)


def multi_head_differ_attention(x, fused):
    b, s, d = x.shape
    x2d = x.reshape(b * s, d)                                       # contiguous, free
    out = pl.pallas_call(
        fused_diff_attn_kernel,
        grid=(1,),
        in_specs=[
            pl.BlockSpec((b * s, d), lambda i: (0, 0)),             # x (both batches)
            pl.BlockSpec((d, 5 * d), lambda i: (0, 0)),             # fused W (+swap folded)
            pl.BlockSpec((1, 5 * d), lambda i: (0, 0)),             # fused bias
            pl.BlockSpec((4, b * s, d), lambda i: (0, 0, 0)),       # rope planes
            pl.BlockSpec(memory_space=pltpu.MemorySpace.SMEM),      # lambda scalar (1,1)
        ],
        out_specs=pl.BlockSpec((s, b * d), lambda i: (0, 0)),       # lane-dense slab
        out_shape=jax.ShapeDtypeStruct((s, b * d), jnp.float32),
    )(x2d, fused["w_qkv"], fused["b_qkv"], fused["rope"], fused["lam"])
    # unpack lane-packed (S, B*D) -> (B, S, D) in the wrapper (tiny)
    return jnp.transpose(out.reshape(s, b, d), (1, 0, 2))


# ---------------- parameter / constant preparation (outside the hot path) ---
def precompute_freqs_cis(seqlen, head_dim, theta=10000.0):
    inv = 1.0 / (theta ** (np.arange(0, head_dim, 2, dtype=np.float32) / head_dim))
    t = np.arange(seqlen, dtype=np.float32)
    freqs = np.outer(t, inv)                                        # (S, hd/2)
    return np.cos(freqs), np.sin(freqs)


def init_params(key):
    ks = jax.random.split(key, 10)
    bound = 1.0 / math.sqrt(DIM)
    u = lambda k, shape: jax.random.uniform(k, shape, jnp.float32, -bound, bound)
    n = lambda k: 0.1 * jax.random.normal(k, (HEAD_DIM,), jnp.float32)
    return {
        # nn.Linear weights are (out, in); nn.Linear computes x @ W.T + b.
        "wq": u(ks[0], (DIM, DIM)), "wk": u(ks[1], (DIM, DIM)), "wv": u(ks[2], (DIM, DIM)),
        "bq": u(ks[3], (DIM,)), "bk": u(ks[4], (DIM,)), "bv": u(ks[5], (DIM,)),
        "lq1": n(ks[6]), "lk1": n(ks[7]), "lq2": n(ks[8]), "lk2": n(ks[9]),
    }


def prepare_fused(params, batch, seqlen):
    """One-time layout prep: fused QKV weight with the rotary pair-swap permutation
    folded in ([Wq|Wk|Wv|Wq@P|Wk@P]), RoPE coefficient planes (SCALE folded into the
    Q planes, tiled over the batch rows), and the scalar differential lambda."""
    colidx = np.arange(DIM)
    swap_np = np.zeros((DIM, DIM), np.float32)
    swap_np[colidx, colidx ^ 1] = 1.0                               # swap within rotary pairs
    swap = jnp.asarray(swap_np)

    wq, wk, wv = params["wq"].T, params["wk"].T, params["wv"].T     # x@W form
    bq, bk, bv = params["bq"], params["bk"], params["bv"]
    w_qkv = jnp.concatenate([wq, wk, wv, wq @ swap, wk @ swap], axis=1)           # (D, 5D)
    b_qkv = jnp.concatenate([bq, bk, bv, bq @ swap, bk @ swap]).reshape(1, 5 * DIM)

    cos, sin = precompute_freqs_cis(seqlen, HEAD_DIM)               # (S, hd/2)
    fidx = (colidx % HEAD_DIM) // 2                                 # freq index per flat column
    sign = np.where(colidx % 2 == 0, -1.0, 1.0).astype(np.float32)  # -sin on even, +sin on odd
    cos_full = cos[:, fidx].astype(np.float32)                      # (S, D)
    sin_signed = (sin[:, fidx] * sign[None, :]).astype(np.float32)  # (S, D)
    rope_1b = np.stack([cos_full * SCALE, sin_signed * SCALE,       # Q planes (scale folded)
                        cos_full, sin_signed]).astype(np.float32)   # K planes
    rope = np.tile(rope_1b, (1, batch, 1))                          # (4, B*S, D)

    lam = (jnp.exp(jnp.sum(params["lq1"] * params["lk1"]))
           - jnp.exp(jnp.sum(params["lq2"] * params["lk2"]))
           + jnp.float32(LAMBDA_INIT)).reshape(1, 1).astype(jnp.float32)

    return {"w_qkv": w_qkv, "b_qkv": b_qkv, "rope": jnp.asarray(rope), "lam": lam}


if __name__ == "__main__":
    key = jax.random.PRNGKey(0)
    pkey, xkey = jax.random.split(key)
    params = init_params(pkey)
    fused = prepare_fused(params, B, S)
    x = jax.random.normal(xkey, (B, S, DIM), jnp.float32)

    out = jax.jit(multi_head_differ_attention)(x, fused)
    jax.block_until_ready(out)
    assert out.shape == (B, S, DIM)
    assert bool(jnp.all(jnp.isfinite(out)))
    print("KERNEL_OK")
</pallas_src>

<mosaic_0001>
module attributes {stable_mosaic.version = 11 : i64} {
  func.func @fused_diff_attn_kernel(%arg0: i32, %arg1: memref<32x64xf32, #tpu.memory_space<vmem>>, %arg2: memref<64x320xf32, #tpu.memory_space<vmem>>, %arg3: memref<1x320xf32, #tpu.memory_space<vmem>>, %arg4: memref<4x32x64xf32, #tpu.memory_space<vmem>>, %arg5: memref<1x1xf32, #tpu.memory_space<smem>>, %arg6: memref<16x128xf32, #tpu.memory_space<vmem>>) attributes {dimension_semantics = [#tpu.dimension_semantics<arbitrary>], iteration_bounds = array<i64: 1>, scalar_prefetch = 0 : i64, scratch_operands = 0 : i64, tpu.core_type = #tpu.core_type<tc>, window_params = [{pipeline_mode = #tpu.pipeline_mode<synchronous>, transform_indices = @transform_0, window_bounds = array<i64: 32, 64>}, {pipeline_mode = #tpu.pipeline_mode<synchronous>, transform_indices = @transform_1, window_bounds = array<i64: 64, 320>}, {pipeline_mode = #tpu.pipeline_mode<synchronous>, transform_indices = @transform_2, window_bounds = array<i64: 1, 320>}, {pipeline_mode = #tpu.pipeline_mode<synchronous>, transform_indices = @transform_3, window_bounds = array<i64: 4, 32, 64>}, {transform_indices = @transform_4, window_bounds = array<i64: 1, 1>}, {pipeline_mode = #tpu.pipeline_mode<synchronous>, transform_indices = @transform_5, window_bounds = array<i64: 16, 128>}]} {
    %c0 = arith.constant 0 : index
    %c0_0 = arith.constant 0 : index
    %0 = vector.load %arg1[%c0, %c0_0] : memref<32x64xf32, #tpu.memory_space<vmem>>, vector<32x64xf32>
    %c0_1 = arith.constant 0 : index
    %c0_2 = arith.constant 0 : index
    %1 = vector.load %arg2[%c0_1, %c0_2] : memref<64x320xf32, #tpu.memory_space<vmem>>, vector<64x320xf32>
    %cst = arith.constant dense<0.000000e+00> : vector<32x320xf32>
    %2 = tpu.matmul %0, %1, %cst {dimension_numbers = #tpu.dot_dimension_numbers<[1], [0], [0], [1], [0, 0, 1, 1], [], []>} : vector<32x64xf32>, vector<64x320xf32>, vector<32x320xf32> -> vector<32x320xf32>
    %c0_3 = arith.constant 0 : index
    %c0_4 = arith.constant 0 : index
    %3 = vector.load %arg3[%c0_3, %c0_4] : memref<1x320xf32, #tpu.memory_space<vmem>>, vector<1x320xf32>
    %4 = vector.broadcast %3 : vector<1x320xf32> to vector<32x320xf32>
    %5 = arith.addf %2, %4 : vector<32x320xf32>
    %6 = vector.extract_strided_slice %5 {offsets = [0, 0], sizes = [32, 64], strides = [1, 1]} : vector<32x320xf32> to vector<32x64xf32>
    %7 = vector.extract_strided_slice %5 {offsets = [0, 64], sizes = [32, 64], strides = [1, 1]} : vector<32x320xf32> to vector<32x64xf32>
    %8 = vector.extract_strided_slice %5 {offsets = [0, 128], sizes = [32, 64], strides = [1, 1]} : vector<32x320xf32> to vector<32x64xf32>
    %9 = vector.extract_strided_slice %5 {offsets = [0, 192], sizes = [32, 64], strides = [1, 1]} : vector<32x320xf32> to vector<32x64xf32>
    %10 = vector.extract_strided_slice %5 {offsets = [0, 256], sizes = [32, 64], strides = [1, 1]} : vector<32x320xf32> to vector<32x64xf32>
    %c0_5 = arith.constant 0 : index
    %c0_6 = arith.constant 0 : index
    %c0_7 = arith.constant 0 : index
    %11 = vector.load %arg4[%c0_5, %c0_6, %c0_7] : memref<4x32x64xf32, #tpu.memory_space<vmem>>, vector<1x32x64xf32>
    %12 = vector.shape_cast %11 : vector<1x32x64xf32> to vector<32x64xf32>
    %13 = arith.mulf %6, %12 : vector<32x64xf32>
    %c1 = arith.constant 1 : index
    %c0_8 = arith.constant 0 : index
    %c0_9 = arith.constant 0 : index
    %14 = vector.load %arg4[%c1, %c0_8, %c0_9] : memref<4x32x64xf32, #tpu.memory_space<vmem>>, vector<1x32x64xf32>
    %15 = vector.shape_cast %14 : vector<1x32x64xf32> to vector<32x64xf32>
    %16 = arith.mulf %9, %15 : vector<32x64xf32>
    %17 = arith.addf %13, %16 : vector<32x64xf32>
    %c2 = arith.constant 2 : index
    %c0_10 = arith.constant 0 : index
    %c0_11 = arith.constant 0 : index
    %18 = vector.load %arg4[%c2, %c0_10, %c0_11] : memref<4x32x64xf32, #tpu.memory_space<vmem>>, vector<1x32x64xf32>
    %19 = vector.shape_cast %18 : vector<1x32x64xf32> to vector<32x64xf32>
    %20 = arith.mulf %7, %19 : vector<32x64xf32>
    %c3 = arith.constant 3 : index
    %c0_12 = arith.constant 0 : index
    %c0_13 = arith.constant 0 : index
    %21 = vector.load %arg4[%c3, %c0_12, %c0_13] : memref<4x32x64xf32, #tpu.memory_space<vmem>>, vector<1x32x64xf32>
    %22 = vector.shape_cast %21 : vector<1x32x64xf32> to vector<32x64xf32>
    %23 = arith.mulf %10, %22 : vector<32x64xf32>
    %24 = arith.addf %20, %23 : vector<32x64xf32>
    %c0_14 = arith.constant 0 : index
    %c0_15 = arith.constant 0 : index
    %25 = memref.load %arg5[%c0_14, %c0_15] : memref<1x1xf32, #tpu.memory_space<smem>>
    %26 = tpu.iota {dimensions = array<i32: 0>} : vector<16x16xi32>
    %27 = tpu.iota {dimensions = array<i32: 1>} : vector<16x16xi32>
    %28 = arith.cmpi sgt, %27, %26 : vector<16x16xi32>
    %29 = vector.extract_strided_slice %17 {offsets = [0, 0], sizes = [16, 64], strides = [1, 1]} : vector<32x64xf32> to vector<16x64xf32>
    %30 = vector.extract_strided_slice %24 {offsets = [0, 0], sizes = [16, 64], strides = [1, 1]} : vector<32x64xf32> to vector<16x64xf32>
    %31 = vector.extract_strided_slice %8 {offsets = [0, 0], sizes = [16, 64], strides = [1, 1]} : vector<32x64xf32> to vector<16x64xf32>
    %32 = vector.extract_strided_slice %29 {offsets = [0, 0], sizes = [16, 8], strides = [1, 1]} : vector<16x64xf32> to vector<16x8xf32>
    %33 = vector.extract_strided_slice %30 {offsets = [0, 0], sizes = [16, 8], strides = [1, 1]} : vector<16x64xf32> to vector<16x8xf32>
    %cst_16 = arith.constant dense<0.000000e+00> : vector<16x16xf32>
    %34 = tpu.matmul %32, %33, %cst_16 {dimension_numbers = #tpu.dot_dimension_numbers<[1], [1], [0], [0], [0, 0, 1, 0], [], []>} : vector<16x8xf32>, vector<16x8xf32>, vector<16x16xf32> -> vector<16x16xf32>
    %cst_17 = arith.constant 0xFF800000 : f32
    %35 = vector.broadcast %cst_17 : f32 to vector<16x16xf32>
    %36 = arith.select %28, %35, %34 : vector<16x16xi1>, vector<16x16xf32>
    %cst_18 = arith.constant dense<0xFF800000> : vector<16xf32>
    %37 = vector.multi_reduction <maximumf>, %36, %cst_18 [1] : vector<16x16xf32> to vector<16xf32>
    %38 = vector.shape_cast %37 : vector<16xf32> to vector<16x1xf32>
    %39 = vector.broadcast %38 : vector<16x1xf32> to vector<16x16xf32>
    %40 = arith.subf %36, %39 : vector<16x16xf32>
    %41 = math.exp %40 : vector<16x16xf32>
    %cst_19 = arith.constant dense<0.000000e+00> : vector<16xf32>
    %42 = vector.multi_reduction <add>, %41, %cst_19 [1] : vector<16x16xf32> to vector<16xf32>
    %43 = vector.shape_cast %42 : vector<16xf32> to vector<16x1xf32>
    %44 = tpu.reciprocal %43 {approx = true} : vector<16x1xf32> -> vector<16x1xf32>
    %45 = vector.broadcast %44 : vector<16x1xf32> to vector<16x16xf32>
    %46 = arith.mulf %41, %45 : vector<16x16xf32>
    %47 = vector.extract_strided_slice %29 {offsets = [0, 8], sizes = [16, 8], strides = [1, 1]} : vector<16x64xf32> to vector<16x8xf32>
    %48 = vector.extract_strided_slice %30 {offsets = [0, 8], sizes = [16, 8], strides = [1, 1]} : vector<16x64xf32> to vector<16x8xf32>
    %cst_20 = arith.constant dense<0.000000e+00> : vector<16x16xf32>
    %49 = tpu.matmul %47, %48, %cst_20 {dimension_numbers = #tpu.dot_dimension_numbers<[1], [1], [0], [0], [0, 0, 1, 0], [], []>} : vector<16x8xf32>, vector<16x8xf32>, vector<16x16xf32> -> vector<16x16xf32>
    %cst_21 = arith.constant 0xFF800000 : f32
    %50 = vector.broadcast %cst_21 : f32 to vector<16x16xf32>
    %51 = arith.select %28, %50, %49 : vector<16x16xi1>, vector<16x16xf32>
    %cst_22 = arith.constant dense<0xFF800000> : vector<16xf32>
    %52 = vector.multi_reduction <maximumf>, %51, %cst_22 [1] : vector<16x16xf32> to vector<16xf32>
    %53 = vector.shape_cast %52 : vector<16xf32> to vector<16x1xf32>
    %54 = vector.broadcast %53 : vector<16x1xf32> to vector<16x16xf32>
    %55 = arith.subf %51, %54 : vector<16x16xf32>
    %56 = math.exp %55 : vector<16x16xf32>
    %cst_23 = arith.constant dense<0.000000e+00> : vector<16xf32>
    %57 = vector.multi_reduction <add>, %56, %cst_23 [1] : vector<16x16xf32> to vector<16xf32>
    %58 = vector.shape_cast %57 : vector<16xf32> to vector<16x1xf32>
    %59 = tpu.reciprocal %58 {approx = true} : vector<16x1xf32> -> vector<16x1xf32>
    %60 = vector.broadcast %59 : vector<16x1xf32> to vector<16x16xf32>
    %61 = arith.mulf %56, %60 : vector<16x16xf32>
    %62 = vector.broadcast %25 : f32 to vector<16x16xf32>
    %63 = arith.mulf %62, %61 : vector<16x16xf32>
    %64 = arith.subf %46, %63 : vector<16x16xf32>
    %65 = vector.extract_strided_slice %31 {offsets = [0, 0], sizes = [16, 16], strides = [1, 1]} : vector<16x64xf32> to vector<16x16xf32>
    %cst_24 = arith.constant dense<0.000000e+00> : vector<16x16xf32>
    %66 = tpu.matmul %64, %65, %cst_24 {dimension_numbers = #tpu.dot_dimension_numbers<[1], [0], [0], [1], [0, 0, 1, 1], [], []>} : vector<16x16xf32>, vector<16x16xf32>, vector<16x16xf32> -> vector<16x16xf32>
    %67 = vector.extract_strided_slice %29 {offsets = [0, 16], sizes = [16, 8], strides = [1, 1]} : vector<16x64xf32> to vector<16x8xf32>
    %68 = vector.extract_strided_slice %30 {offsets = [0, 16], sizes = [16, 8], strides = [1, 1]} : vector<16x64xf32> to vector<16x8xf32>
    %cst_25 = arith.constant dense<0.000000e+00> : vector<16x16xf32>
    %69 = tpu.matmul %67, %68, %cst_25 {dimension_numbers = #tpu.dot_dimension_numbers<[1], [1], [0], [0], [0, 0, 1, 0], [], []>} : vector<16x8xf32>, vector<16x8xf32>, vector<16x16xf32> -> vector<16x16xf32>
    %cst_26 = arith.constant 0xFF800000 : f32
    %70 = vector.broadcast %cst_26 : f32 to vector<16x16xf32>
    %71 = arith.select %28, %70, %69 : vector<16x16xi1>, vector<16x16xf32>
    %cst_27 = arith.constant dense<0xFF800000> : vector<16xf32>
    %72 = vector.multi_reduction <maximumf>, %71, %cst_27 [1] : vector<16x16xf32> to vector<16xf32>
    %73 = vector.shape_cast %72 : vector<16xf32> to vector<16x1xf32>
    %74 = vector.broadcast %73 : vector<16x1xf32> to vector<16x16xf32>
    %75 = arith.subf %71, %74 : vector<16x16xf32>
    %76 = math.exp %75 : vector<16x16xf32>
    %cst_28 = arith.constant dense<0.000000e+00> : vector<16xf32>
    %77 = vector.multi_reduction <add>, %76, %cst_28 [1] : vector<16x16xf32> to vector<16xf32>
    %78 = vector.shape_cast %77 : vector<16xf32> to vector<16x1xf32>
    %79 = tpu.reciprocal %78 {approx = true} : vector<16x1xf32> -> vector<16x1xf32>
    %80 = vector.broadcast %79 : vector<16x1xf32> to vector<16x16xf32>
    %81 = arith.mulf %76, %80 : vector<16x16xf32>
    %82 = vector.extract_strided_slice %29 {offsets = [0, 24], sizes = [16, 8], strides = [1, 1]} : vector<16x64xf32> to vector<16x8xf32>
    %83 = vector.extract_strided_slice %30 {offsets = [0, 24], sizes = [16, 8], strides = [1, 1]} : vector<16x64xf32> to vector<16x8xf32>
    %cst_29 = arith.constant dense<0.000000e+00> : vector<16x16xf32>
    %84 = tpu.matmul %82, %83, %cst_29 {dimension_numbers = #tpu.dot_dimension_numbers<[1], [1], [0], [0], [0, 0, 1, 0], [], []>} : vector<16x8xf32>, vector<16x8xf32>, vector<16x16xf32> -> vector<16x16xf32>
    %cst_30 = arith.constant 0xFF800000 : f32
    %85 = vector.broadcast %cst_30 : f32 to vector<16x16xf32>
    %86 = arith.select %28, %85, %84 : vector<16x16xi1>, vector<16x16xf32>
    %cst_31 = arith.constant dense<0xFF800000> : vector<16xf32>
    %87 = vector.multi_reduction <maximumf>, %86, %cst_31 [1] : vector<16x16xf32> to vector<16xf32>
    %88 = vector.shape_cast %87 : vector<16xf32> to vector<16x1xf32>
    %89 = vector.broadcast %88 : vector<16x1xf32> to vector<16x16xf32>
    %90 = arith.subf %86, %89 : vector<16x16xf32>
    %91 = math.exp %90 : vector<16x16xf32>
    %cst_32 = arith.constant dense<0.000000e+00> : vector<16xf32>
    %92 = vector.multi_reduction <add>, %91, %cst_32 [1] : vector<16x16xf32> to vector<16xf32>
    %93 = vector.shape_cast %92 : vector<16xf32> to vector<16x1xf32>
    %94 = tpu.reciprocal %93 {approx = true} : vector<16x1xf32> -> vector<16x1xf32>
    %95 = vector.broadcast %94 : vector<16x1xf32> to vector<16x16xf32>
    %96 = arith.mulf %91, %95 : vector<16x16xf32>
    %97 = vector.broadcast %25 : f32 to vector<16x16xf32>
    %98 = arith.mulf %97, %96 : vector<16x16xf32>
    %99 = arith.subf %81, %98 : vector<16x16xf32>
    %100 = vector.extract_strided_slice %31 {offsets = [0, 16], sizes = [16, 16], strides = [1, 1]} : vector<16x64xf32> to vector<16x16xf32>
    %cst_33 = arith.constant dense<0.000000e+00> : vector<16x16xf32>
    %101 = tpu.matmul %99, %100, %cst_33 {dimension_numbers = #tpu.dot_dimension_numbers<[1], [0], [0], [1], [0, 0, 1, 1], [], []>} : vector<16x16xf32>, vector<16x16xf32>, vector<16x16xf32> -> vector<16x16xf32>
    %102 = vector.extract_strided_slice %29 {offsets = [0, 32], sizes = [16, 8], strides = [1, 1]} : vector<16x64xf32> to vector<16x8xf32>
    %103 = vector.extract_strided_slice %30 {offsets = [0, 32], sizes = [16, 8], strides = [1, 1]} : vector<16x64xf32> to vector<16x8xf32>
    %cst_34 = arith.constant dense<0.000000e+00> : vector<16x16xf32>
    %104 = tpu.matmul %102, %103, %cst_34 {dimension_numbers = #tpu.dot_dimension_numbers<[1], [1], [0], [0], [0, 0, 1, 0], [], []>} : vector<16x8xf32>, vector<16x8xf32>, vector<16x16xf32> -> vector<16x16xf32>
    %cst_35 = arith.constant 0xFF800000 : f32
    %105 = vector.broadcast %cst_35 : f32 to vector<16x16xf32>
    %106 = arith.select %28, %105, %104 : vector<16x16xi1>, vector<16x16xf32>
    %cst_36 = arith.constant dense<0xFF800000> : vector<16xf32>
    %107 = vector.multi_reduction <maximumf>, %106, %cst_36 [1] : vector<16x16xf32> to vector<16xf32>
    %108 = vector.shape_cast %107 : vector<16xf32> to vector<16x1xf32>
    %109 = vector.broadcast %108 : vector<16x1xf32> to vector<16x16xf32>
    %110 = arith.subf %106, %109 : vector<16x16xf32>
    %111 = math.exp %110 : vector<16x16xf32>
    %cst_37 = arith.constant dense<0.000000e+00> : vector<16xf32>
    %112 = vector.multi_reduction <add>, %111, %cst_37 [1] : vector<16x16xf32> to vector<16xf32>
    %113 = vector.shape_cast %112 : vector<16xf32> to vector<16x1xf32>
    %114 = tpu.reciprocal %113 {approx = true} : vector<16x1xf32> -> vector<16x1xf32>
    %115 = vector.broadcast %114 : vector<16x1xf32> to vector<16x16xf32>
    %116 = arith.mulf %111, %115 : vector<16x16xf32>
    %117 = vector.extract_strided_slice %29 {offsets = [0, 40], sizes = [16, 8], strides = [1, 1]} : vector<16x64xf32> to vector<16x8xf32>
    %118 = vector.extract_strided_slice %30 {offsets = [0, 40], sizes = [16, 8], strides = [1, 1]} : vector<16x64xf32> to vector<16x8xf32>
    %cst_38 = arith.constant dense<0.000000e+00> : vector<16x16xf32>
    %119 = tpu.matmul %117, %118, %cst_38 {dimension_numbers = #tpu.dot_dimension_numbers<[1], [1], [0], [0], [0, 0, 1, 0], [], []>} : vector<16x8xf32>, vector<16x8xf32>, vector<16x16xf32> -> vector<16x16xf32>
    %cst_39 = arith.constant 0xFF800000 : f32
    %120 = vector.broadcast %cst_39 : f32 to vector<16x16xf32>
    %121 = arith.select %28, %120, %119 : vector<16x16xi1>, vector<16x16xf32>
    %cst_40 = arith.constant dense<0xFF800000> : vector<16xf32>
    %122 = vector.multi_reduction <maximumf>, %121, %cst_40 [1] : vector<16x16xf32> to vector<16xf32>
    %123 = vector.shape_cast %122 : vector<16xf32> to vector<16x1xf32>
    %124 = vector.broadcast %123 : vector<16x1xf32> to vector<16x16xf32>
    %125 = arith.subf %121, %124 : vector<16x16xf32>
    %126 = math.exp %125 : vector<16x16xf32>
    %cst_41 = arith.constant dense<0.000000e+00> : vector<16xf32>
    %127 = vector.multi_reduction <add>, %126, %cst_41 [1] : vector<16x16xf32> to vector<16xf32>
    %128 = vector.shape_cast %127 : vector<16xf32> to vector<16x1xf32>
    %129 = tpu.reciprocal %128 {approx = true} : vector<16x1xf32> -> vector<16x1xf32>
    %130 = vector.broadcast %129 : vector<16x1xf32> to vector<16x16xf32>
    %131 = arith.mulf %126, %130 : vector<16x16xf32>
    %132 = vector.broadcast %25 : f32 to vector<16x16xf32>
    %133 = arith.mulf %132, %131 : vector<16x16xf32>
    %134 = arith.subf %116, %133 : vector<16x16xf32>
    %135 = vector.extract_strided_slice %31 {offsets = [0, 32], sizes = [16, 16], strides = [1, 1]} : vector<16x64xf32> to vector<16x16xf32>
    %cst_42 = arith.constant dense<0.000000e+00> : vector<16x16xf32>
    %136 = tpu.matmul %134, %135, %cst_42 {dimension_numbers = #tpu.dot_dimension_numbers<[1], [0], [0], [1], [0, 0, 1, 1], [], []>} : vector<16x16xf32>, vector<16x16xf32>, vector<16x16xf32> -> vector<16x16xf32>
    %137 = vector.extract_strided_slice %29 {offsets = [0, 48], sizes = [16, 8], strides = [1, 1]} : vector<16x64xf32> to vector<16x8xf32>
    %138 = vector.extract_strided_slice %30 {offsets = [0, 48], sizes = [16, 8], strides = [1, 1]} : vector<16x64xf32> to vector<16x8xf32>
    %cst_43 = arith.constant dense<0.000000e+00> : vector<16x16xf32>
    %139 = tpu.matmul %137, %138, %cst_43 {dimension_numbers = #tpu.dot_dimension_numbers<[1], [1], [0], [0], [0, 0, 1, 0], [], []>} : vector<16x8xf32>, vector<16x8xf32>, vector<16x16xf32> -> vector<16x16xf32>
    %cst_44 = arith.constant 0xFF800000 : f32
    %140 = vector.broadcast %cst_44 : f32 to vector<16x16xf32>
    %141 = arith.select %28, %140, %139 : vector<16x16xi1>, vector<16x16xf32>
    %cst_45 = arith.constant dense<0xFF800000> : vector<16xf32>
    %142 = vector.multi_reduction <maximumf>, %141, %cst_45 [1] : vector<16x16xf32> to vector<16xf32>
    %143 = vector.shape_cast %142 : vector<16xf32> to vector<16x1xf32>
    %144 = vector.broadcast %143 : vector<16x1xf32> to vector<16x16xf32>
    %145 = arith.subf %141, %144 : vector<16x16xf32>
    %146 = math.exp %145 : vector<16x16xf32>
    %cst_46 = arith.constant dense<0.000000e+00> : vector<16xf32>
    %147 = vector.multi_reduction <add>, %146, %cst_46 [1] : vector<16x16xf32> to vector<16xf32>
    %148 = vector.shape_cast %147 : vector<16xf32> to vector<16x1xf32>
    %149 = tpu.reciprocal %148 {approx = true} : vector<16x1xf32> -> vector<16x1xf32>
    %150 = vector.broadcast %149 : vector<16x1xf32> to vector<16x16xf32>
    %151 = arith.mulf %146, %150 : vector<16x16xf32>
    %152 = vector.extract_strided_slice %29 {offsets = [0, 56], sizes = [16, 8], strides = [1, 1]} : vector<16x64xf32> to vector<16x8xf32>
    %153 = vector.extract_strided_slice %30 {offsets = [0, 56], sizes = [16, 8], strides = [1, 1]} : vector<16x64xf32> to vector<16x8xf32>
    %cst_47 = arith.constant dense<0.000000e+00> : vector<16x16xf32>
    %154 = tpu.matmul %152, %153, %cst_47 {dimension_numbers = #tpu.dot_dimension_numbers<[1], [1], [0], [0], [0, 0, 1, 0], [], []>} : vector<16x8xf32>, vector<16x8xf32>, vector<16x16xf32> -> vector<16x16xf32>
    %cst_48 = arith.constant 0xFF800000 : f32
    %155 = vector.broadcast %cst_48 : f32 to vector<16x16xf32>
    %156 = arith.select %28, %155, %154 : vector<16x16xi1>, vector<16x16xf32>
    %cst_49 = arith.constant dense<0xFF800000> : vector<16xf32>
    %157 = vector.multi_reduction <maximumf>, %156, %cst_49 [1] : vector<16x16xf32> to vector<16xf32>
    %158 = vector.shape_cast %157 : vector<16xf32> to vector<16x1xf32>
    %159 = vector.broadcast %158 : vector<16x1xf32> to vector<16x16xf32>
    %160 = arith.subf %156, %159 : vector<16x16xf32>
    %161 = math.exp %160 : vector<16x16xf32>
    %cst_50 = arith.constant dense<0.000000e+00> : vector<16xf32>
    %162 = vector.multi_reduction <add>, %161, %cst_50 [1] : vector<16x16xf32> to vector<16xf32>
    %163 = vector.shape_cast %162 : vector<16xf32> to vector<16x1xf32>
    %164 = tpu.reciprocal %163 {approx = true} : vector<16x1xf32> -> vector<16x1xf32>
    %165 = vector.broadcast %164 : vector<16x1xf32> to vector<16x16xf32>
    %166 = arith.mulf %161, %165 : vector<16x16xf32>
    %167 = vector.broadcast %25 : f32 to vector<16x16xf32>
    %168 = arith.mulf %167, %166 : vector<16x16xf32>
    %169 = arith.subf %151, %168 : vector<16x16xf32>
    %170 = vector.extract_strided_slice %31 {offsets = [0, 48], sizes = [16, 16], strides = [1, 1]} : vector<16x64xf32> to vector<16x16xf32>
    %cst_51 = arith.constant dense<0.000000e+00> : vector<16x16xf32>
    %171 = tpu.matmul %169, %170, %cst_51 {dimension_numbers = #tpu.dot_dimension_numbers<[1], [0], [0], [1], [0, 0, 1, 1], [], []>} : vector<16x16xf32>, vector<16x16xf32>, vector<16x16xf32> -> vector<16x16xf32>
    %172 = vector.extract_strided_slice %17 {offsets = [16, 0], sizes = [16, 64], strides = [1, 1]} : vector<32x64xf32> to vector<16x64xf32>
    %173 = vector.extract_strided_slice %24 {offsets = [16, 0], sizes = [16, 64], strides = [1, 1]} : vector<32x64xf32> to vector<16x64xf32>
    %174 = vector.extract_strided_slice %8 {offsets = [16, 0], sizes = [16, 64], strides = [1, 1]} : vector<32x64xf32> to vector<16x64xf32>
    %175 = vector.extract_strided_slice %172 {offsets = [0, 0], sizes = [16, 8], strides = [1, 1]} : vector<16x64xf32> to vector<16x8xf32>
    %176 = vector.extract_strided_slice %173 {offsets = [0, 0], sizes = [16, 8], strides = [1, 1]} : vector<16x64xf32> to vector<16x8xf32>
    %cst_52 = arith.constant dense<0.000000e+00> : vector<16x16xf32>
    %177 = tpu.matmul %175, %176, %cst_52 {dimension_numbers = #tpu.dot_dimension_numbers<[1], [1], [0], [0], [0, 0, 1, 0], [], []>} : vector<16x8xf32>, vector<16x8xf32>, vector<16x16xf32> -> vector<16x16xf32>
    %cst_53 = arith.constant 0xFF800000 : f32
    %178 = vector.broadcast %cst_53 : f32 to vector<16x16xf32>
    %179 = arith.select %28, %178, %177 : vector<16x16xi1>, vector<16x16xf32>
    %cst_54 = arith.constant dense<0xFF800000> : vector<16xf32>
    %180 = vector.multi_reduction <maximumf>, %179, %cst_54 [1] : vector<16x16xf32> to vector<16xf32>
    %181 = vector.shape_cast %180 : vector<16xf32> to vector<16x1xf32>
    %182 = vector.broadcast %181 : vector<16x1xf32> to vector<16x16xf32>
    %183 = arith.subf %179, %182 : vector<16x16xf32>
    %184 = math.exp %183 : vector<16x16xf32>
    %cst_55 = arith.constant dense<0.000000e+00> : vector<16xf32>
    %185 = vector.multi_reduction <add>, %184, %cst_55 [1] : vector<16x16xf32> to vector<16xf32>
    %186 = vector.shape_cast %185 : vector<16xf32> to vector<16x1xf32>
    %187 = tpu.reciprocal %186 {approx = true} : vector<16x1xf32> -> vector<16x1xf32>
    %188 = vector.broadcast %187 : vector<16x1xf32> to vector<16x16xf32>
    %189 = arith.mulf %184, %188 : vector<16x16xf32>
    %190 = vector.extract_strided_slice %172 {offsets = [0, 8], sizes = [16, 8], strides = [1, 1]} : vector<16x64xf32> to vector<16x8xf32>
    %191 = vector.extract_strided_slice %173 {offsets = [0, 8], sizes = [16, 8], strides = [1, 1]} : vector<16x64xf32> to vector<16x8xf32>
    %cst_56 = arith.constant dense<0.000000e+00> : vector<16x16xf32>
    %192 = tpu.matmul %190, %191, %cst_56 {dimension_numbers = #tpu.dot_dimension_numbers<[1], [1], [0], [0], [0, 0, 1, 0], [], []>} : vector<16x8xf32>, vector<16x8xf32>, vector<16x16xf32> -> vector<16x16xf32>
    %cst_57 = arith.constant 0xFF800000 : f32
    %193 = vector.broadcast %cst_57 : f32 to vector<16x16xf32>
    %194 = arith.select %28, %193, %192 : vector<16x16xi1>, vector<16x16xf32>
    %cst_58 = arith.constant dense<0xFF800000> : vector<16xf32>
    %195 = vector.multi_reduction <maximumf>, %194, %cst_58 [1] : vector<16x16xf32> to vector<16xf32>
    %196 = vector.shape_cast %195 : vector<16xf32> to vector<16x1xf32>
    %197 = vector.broadcast %196 : vector<16x1xf32> to vector<16x16xf32>
    %198 = arith.subf %194, %197 : vector<16x16xf32>
    %199 = math.exp %198 : vector<16x16xf32>
    %cst_59 = arith.constant dense<0.000000e+00> : vector<16xf32>
    %200 = vector.multi_reduction <add>, %199, %cst_59 [1] : vector<16x16xf32> to vector<16xf32>
    %201 = vector.shape_cast %200 : vector<16xf32> to vector<16x1xf32>
    %202 = tpu.reciprocal %201 {approx = true} : vector<16x1xf32> -> vector<16x1xf32>
    %203 = vector.broadcast %202 : vector<16x1xf32> to vector<16x16xf32>
    %204 = arith.mulf %199, %203 : vector<16x16xf32>
    %205 = vector.broadcast %25 : f32 to vector<16x16xf32>
    %206 = arith.mulf %205, %204 : vector<16x16xf32>
    %207 = arith.subf %189, %206 : vector<16x16xf32>
    %208 = vector.extract_strided_slice %174 {offsets = [0, 0], sizes = [16, 16], strides = [1, 1]} : vector<16x64xf32> to vector<16x16xf32>
    %cst_60 = arith.constant dense<0.000000e+00> : vector<16x16xf32>
    %209 = tpu.matmul %207, %208, %cst_60 {dimension_numbers = #tpu.dot_dimension_numbers<[1], [0], [0], [1], [0, 0, 1, 1], [], []>} : vector<16x16xf32>, vector<16x16xf32>, vector<16x16xf32> -> vector<16x16xf32>
    %210 = vector.extract_strided_slice %172 {offsets = [0, 16], sizes = [16, 8], strides = [1, 1]} : vector<16x64xf32> to vector<16x8xf32>
    %211 = vector.extract_strided_slice %173 {offsets = [0, 16], sizes = [16, 8], strides = [1, 1]} : vector<16x64xf32> to vector<16x8xf32>
    %cst_61 = arith.constant dense<0.000000e+00> : vector<16x16xf32>
    %212 = tpu.matmul %210, %211, %cst_61 {dimension_numbers = #tpu.dot_dimension_numbers<[1], [1], [0], [0], [0, 0, 1, 0], [], []>} : vector<16x8xf32>, vector<16x8xf32>, vector<16x16xf32> -> vector<16x16xf32>
    %cst_62 = arith.constant 0xFF800000 : f32
    %213 = vector.broadcast %cst_62 : f32 to vector<16x16xf32>
    %214 = arith.select %28, %213, %212 : vector<16x16xi1>, vector<16x16xf32>
    %cst_63 = arith.constant dense<0xFF800000> : vector<16xf32>
    %215 = vector.multi_reduction <maximumf>, %214, %cst_63 [1] : vector<16x16xf32> to vector<16xf32>
    %216 = vector.shape_cast %215 : vector<16xf32> to vector<16x1xf32>
    %217 = vector.broadcast %216 : vector<16x1xf32> to vector<16x16xf32>
    %218 = arith.subf %214, %217 : vector<16x16xf32>
    %219 = math.exp %218 : vector<16x16xf32>
    %cst_64 = arith.constant dense<0.000000e+00> : vector<16xf32>
    %220 = vector.multi_reduction <add>, %219, %cst_64 [1] : vector<16x16xf32> to vector<16xf32>
    %221 = vector.shape_cast %220 : vector<16xf32> to vector<16x1xf32>
    %222 = tpu.reciprocal %221 {approx = true} : vector<16x1xf32> -> vector<16x1xf32>
    %223 = vector.broadcast %222 : vector<16x1xf32> to vector<16x16xf32>
    %224 = arith.mulf %219, %223 : vector<16x16xf32>
    %225 = vector.extract_strided_slice %172 {offsets = [0, 24], sizes = [16, 8], strides = [1, 1]} : vector<16x64xf32> to vector<16x8xf32>
    %226 = vector.extract_strided_slice %173 {offsets = [0, 24], sizes = [16, 8], strides = [1, 1]} : vector<16x64xf32> to vector<16x8xf32>
    %cst_65 = arith.constant dense<0.000000e+00> : vector<16x16xf32>
    %227 = tpu.matmul %225, %226, %cst_65 {dimension_numbers = #tpu.dot_dimension_numbers<[1], [1], [0], [0], [0, 0, 1, 0], [], []>} : vector<16x8xf32>, vector<16x8xf32>, vector<16x16xf32> -> vector<16x16xf32>
    %cst_66 = arith.constant 0xFF800000 : f32
    %228 = vector.broadcast %cst_66 : f32 to vector<16x16xf32>
    %229 = arith.select %28, %228, %227 : vector<16x16xi1>, vector<16x16xf32>
    %cst_67 = arith.constant dense<0xFF800000> : vector<16xf32>
    %230 = vector.multi_reduction <maximumf>, %229, %cst_67 [1] : vector<16x16xf32> to vector<16xf32>
    %231 = vector.shape_cast %230 : vector<16xf32> to vector<16x1xf32>
    %232 = vector.broadcast %231 : vector<16x1xf32> to vector<16x16xf32>
    %233 = arith.subf %229, %232 : vector<16x16xf32>
    %234 = math.exp %233 : vector<16x16xf32>
    %cst_68 = arith.constant dense<0.000000e+00> : vector<16xf32>
    %235 = vector.multi_reduction <add>, %234, %cst_68 [1] : vector<16x16xf32> to vector<16xf32>
    %236 = vector.shape_cast %235 : vector<16xf32> to vector<16x1xf32>
    %237 = tpu.reciprocal %236 {approx = true} : vector<16x1xf32> -> vector<16x1xf32>
    %238 = vector.broadcast %237 : vector<16x1xf32> to vector<16x16xf32>
    %239 = arith.mulf %234, %238 : vector<16x16xf32>
    %240 = vector.broadcast %25 : f32 to vector<16x16xf32>
    %241 = arith.mulf %240, %239 : vector<16x16xf32>
    %242 = arith.subf %224, %241 : vector<16x16xf32>
    %243 = vector.extract_strided_slice %174 {offsets = [0, 16], sizes = [16, 16], strides = [1, 1]} : vector<16x64xf32> to vector<16x16xf32>
    %cst_69 = arith.constant dense<0.000000e+00> : vector<16x16xf32>
    %244 = tpu.matmul %242, %243, %cst_69 {dimension_numbers = #tpu.dot_dimension_numbers<[1], [0], [0], [1], [0, 0, 1, 1], [], []>} : vector<16x16xf32>, vector<16x16xf32>, vector<16x16xf32> -> vector<16x16xf32>
    %245 = vector.extract_strided_slice %172 {offsets = [0, 32], sizes = [16, 8], strides = [1, 1]} : vector<16x64xf32> to vector<16x8xf32>
    %246 = vector.extract_strided_slice %173 {offsets = [0, 32], sizes = [16, 8], strides = [1, 1]} : vector<16x64xf32> to vector<16x8xf32>
    %cst_70 = arith.constant dense<0.000000e+00> : vector<16x16xf32>
    %247 = tpu.matmul %245, %246, %cst_70 {dimension_numbers = #tpu.dot_dimension_numbers<[1], [1], [0], [0], [0, 0, 1, 0], [], []>} : vector<16x8xf32>, vector<16x8xf32>, vector<16x16xf32> -> vector<16x16xf32>
    %cst_71 = arith.constant 0xFF800000 : f32
    %248 = vector.broadcast %cst_71 : f32 to vector<16x16xf32>
    %249 = arith.select %28, %248, %247 : vector<16x16xi1>, vector<16x16xf32>
    %cst_72 = arith.constant dense<0xFF800000> : vector<16xf32>
    %250 = vector.multi_reduction <maximumf>, %249, %cst_72 [1] : vector<16x16xf32> to vector<16xf32>
    %251 = vector.shape_cast %250 : vector<16xf32> to vector<16x1xf32>
    %252 = vector.broadcast %251 : vector<16x1xf32> to vector<16x16xf32>
    %253 = arith.subf %249, %252 : vector<16x16xf32>
    %254 = math.exp %253 : vector<16x16xf32>
    %cst_73 = arith.constant dense<0.000000e+00> : vector<16xf32>
    %255 = vector.multi_reduction <add>, %254, %cst_73 [1] : vector<16x16xf32> to vector<16xf32>
    %256 = vector.shape_cast %255 : vector<16xf32> to vector<16x1xf32>
    %257 = tpu.reciprocal %256 {approx = true} : vector<16x1xf32> -> vector<16x1xf32>
    %258 = vector.broadcast %257 : vector<16x1xf32> to vector<16x16xf32>
    %259 = arith.mulf %254, %258 : vector<16x16xf32>
    %260 = vector.extract_strided_slice %172 {offsets = [0, 40], sizes = [16, 8], strides = [1, 1]} : vector<16x64xf32> to vector<16x8xf32>
    %261 = vector.extract_strided_slice %173 {offsets = [0, 40], sizes = [16, 8], strides = [1, 1]} : vector<16x64xf32> to vector<16x8xf32>
    %cst_74 = arith.constant dense<0.000000e+00> : vector<16x16xf32>
    %262 = tpu.matmul %260, %261, %cst_74 {dimension_numbers = #tpu.dot_dimension_numbers<[1], [1], [0], [0], [0, 0, 1, 0], [], []>} : vector<16x8xf32>, vector<16x8xf32>, vector<16x16xf32> -> vector<16x16xf32>
    %cst_75 = arith.constant 0xFF800000 : f32
    %263 = vector.broadcast %cst_75 : f32 to vector<16x16xf32>
    %264 = arith.select %28, %263, %262 : vector<16x16xi1>, vector<16x16xf32>
    %cst_76 = arith.constant dense<0xFF800000> : vector<16xf32>
    %265 = vector.multi_reduction <maximumf>, %264, %cst_76 [1] : vector<16x16xf32> to vector<16xf32>
    %266 = vector.shape_cast %265 : vector<16xf32> to vector<16x1xf32>
    %267 = vector.broadcast %266 : vector<16x1xf32> to vector<16x16xf32>
    %268 = arith.subf %264, %267 : vector<16x16xf32>
    %269 = math.exp %268 : vector<16x16xf32>
    %cst_77 = arith.constant dense<0.000000e+00> : vector<16xf32>
    %270 = vector.multi_reduction <add>, %269, %cst_77 [1] : vector<16x16xf32> to vector<16xf32>
    %271 = vector.shape_cast %270 : vector<16xf32> to vector<16x1xf32>
    %272 = tpu.reciprocal %271 {approx = true} : vector<16x1xf32> -> vector<16x1xf32>
    %273 = vector.broadcast %272 : vector<16x1xf32> to vector<16x16xf32>
    %274 = arith.mulf %269, %273 : vector<16x16xf32>
    %275 = vector.broadcast %25 : f32 to vector<16x16xf32>
    %276 = arith.mulf %275, %274 : vector<16x16xf32>
    %277 = arith.subf %259, %276 : vector<16x16xf32>
    %278 = vector.extract_strided_slice %174 {offsets = [0, 32], sizes = [16, 16], strides = [1, 1]} : vector<16x64xf32> to vector<16x16xf32>
    %cst_78 = arith.constant dense<0.000000e+00> : vector<16x16xf32>
    %279 = tpu.matmul %277, %278, %cst_78 {dimension_numbers = #tpu.dot_dimension_numbers<[1], [0], [0], [1], [0, 0, 1, 1], [], []>} : vector<16x16xf32>, vector<16x16xf32>, vector<16x16xf32> -> vector<16x16xf32>
    %280 = vector.extract_strided_slice %172 {offsets = [0, 48], sizes = [16, 8], strides = [1, 1]} : vector<16x64xf32> to vector<16x8xf32>
    %281 = vector.extract_strided_slice %173 {offsets = [0, 48], sizes = [16, 8], strides = [1, 1]} : vector<16x64xf32> to vector<16x8xf32>
    %cst_79 = arith.constant dense<0.000000e+00> : vector<16x16xf32>
    %282 = tpu.matmul %280, %281, %cst_79 {dimension_numbers = #tpu.dot_dimension_numbers<[1], [1], [0], [0], [0, 0, 1, 0], [], []>} : vector<16x8xf32>, vector<16x8xf32>, vector<16x16xf32> -> vector<16x16xf32>
    %cst_80 = arith.constant 0xFF800000 : f32
    %283 = vector.broadcast %cst_80 : f32 to vector<16x16xf32>
    %284 = arith.select %28, %283, %282 : vector<16x16xi1>, vector<16x16xf32>
    %cst_81 = arith.constant dense<0xFF800000> : vector<16xf32>
    %285 = vector.multi_reduction <maximumf>, %284, %cst_81 [1] : vector<16x16xf32> to vector<16xf32>
    %286 = vector.shape_cast %285 : vector<16xf32> to vector<16x1xf32>
    %287 = vector.broadcast %286 : vector<16x1xf32> to vector<16x16xf32>
    %288 = arith.subf %284, %287 : vector<16x16xf32>
    %289 = math.exp %288 : vector<16x16xf32>
    %cst_82 = arith.constant dense<0.000000e+00> : vector<16xf32>
    %290 = vector.multi_reduction <add>, %289, %cst_82 [1] : vector<16x16xf32> to vector<16xf32>
    %291 = vector.shape_cast %290 : vector<16xf32> to vector<16x1xf32>
    %292 = tpu.reciprocal %291 {approx = true} : vector<16x1xf32> -> vector<16x1xf32>
    %293 = vector.broadcast %292 : vector<16x1xf32> to vector<16x16xf32>
    %294 = arith.mulf %289, %293 : vector<16x16xf32>
    %295 = vector.extract_strided_slice %172 {offsets = [0, 56], sizes = [16, 8], strides = [1, 1]} : vector<16x64xf32> to vector<16x8xf32>
    %296 = vector.extract_strided_slice %173 {offsets = [0, 56], sizes = [16, 8], strides = [1, 1]} : vector<16x64xf32> to vector<16x8xf32>
    %cst_83 = arith.constant dense<0.000000e+00> : vector<16x16xf32>
    %297 = tpu.matmul %295, %296, %cst_83 {dimension_numbers = #tpu.dot_dimension_numbers<[1], [1], [0], [0], [0, 0, 1, 0], [], []>} : vector<16x8xf32>, vector<16x8xf32>, vector<16x16xf32> -> vector<16x16xf32>
    %cst_84 = arith.constant 0xFF800000 : f32
    %298 = vector.broadcast %cst_84 : f32 to vector<16x16xf32>
    %299 = arith.select %28, %298, %297 : vector<16x16xi1>, vector<16x16xf32>
    %cst_85 = arith.constant dense<0xFF800000> : vector<16xf32>
    %300 = vector.multi_reduction <maximumf>, %299, %cst_85 [1] : vector<16x16xf32> to vector<16xf32>
    %301 = vector.shape_cast %300 : vector<16xf32> to vector<16x1xf32>
    %302 = vector.broadcast %301 : vector<16x1xf32> to vector<16x16xf32>
    %303 = arith.subf %299, %302 : vector<16x16xf32>
    %304 = math.exp %303 : vector<16x16xf32>
    %cst_86 = arith.constant dense<0.000000e+00> : vector<16xf32>
    %305 = vector.multi_reduction <add>, %304, %cst_86 [1] : vector<16x16xf32> to vector<16xf32>
    %306 = vector.shape_cast %305 : vector<16xf32> to vector<16x1xf32>
    %307 = tpu.reciprocal %306 {approx = true} : vector<16x1xf32> -> vector<16x1xf32>
    %308 = vector.broadcast %307 : vector<16x1xf32> to vector<16x16xf32>
    %309 = arith.mulf %304, %308 : vector<16x16xf32>
    %310 = vector.broadcast %25 : f32 to vector<16x16xf32>
    %311 = arith.mulf %310, %309 : vector<16x16xf32>
    %312 = arith.subf %294, %311 : vector<16x16xf32>
    %313 = vector.extract_strided_slice %174 {offsets = [0, 48], sizes = [16, 16], strides = [1, 1]} : vector<16x64xf32> to vector<16x16xf32>
    %cst_87 = arith.constant dense<0.000000e+00> : vector<16x16xf32>
    %314 = tpu.matmul %312, %313, %cst_87 {dimension_numbers = #tpu.dot_dimension_numbers<[1], [0], [0], [1], [0, 0, 1, 1], [], []>} : vector<16x16xf32>, vector<16x16xf32>, vector<16x16xf32> -> vector<16x16xf32>
    %315 = tpu.concatenate %66, %101, %136, %171, %209, %244, %279, %314 in 1 : vector<16x16xf32>, vector<16x16xf32>, vector<16x16xf32>, vector<16x16xf32>, vector<16x16xf32>, vector<16x16xf32>, vector<16x16xf32>, vector<16x16xf32> -> vector<16x128xf32>
    %c0_88 = arith.constant 0 : index
    %c0_89 = arith.constant 0 : index
    %316 = vector.load %arg6[%c0_88, %c0_89] : memref<16x128xf32, #tpu.memory_space<vmem>>, vector<16x128xf32>
    tpu.vector_store %arg6[%c0_88, %c0_89], %315 {strides = array<i32>} : memref<16x128xf32, #tpu.memory_space<vmem>>, vector<16x128xf32>,
    return
  }
  func.func @transform_0(%arg0: i32) -> (i32, i32) {
    %c0_i32 = arith.constant 0 : i32
    %c0_i32_0 = arith.constant 0 : i32
    %c0_i32_1 = arith.constant 0 : i32
    return %c0_i32, %c0_i32_0 : i32, i32
  }
  func.func @transform_1(%arg0: i32) -> (i32, i32) {
    %c0_i32 = arith.constant 0 : i32
    %c0_i32_0 = arith.constant 0 : i32
    %c0_i32_1 = arith.constant 0 : i32
    return %c0_i32, %c0_i32_0 : i32, i32
  }
  func.func @transform_2(%arg0: i32) -> (i32, i32) {
    %c0_i32 = arith.constant 0 : i32
    %c0_i32_0 = arith.constant 0 : i32
    %c0_i32_1 = arith.constant 0 : i32
    return %c0_i32, %c0_i32_0 : i32, i32
  }
  func.func @transform_3(%arg0: i32) -> (i32, i32, i32) {
    %c0_i32 = arith.constant 0 : i32
    %c0_i32_0 = arith.constant 0 : i32
    %c0_i32_1 = arith.constant 0 : i32
    %c0_i32_2 = arith.constant 0 : i32
    return %c0_i32, %c0_i32_0, %c0_i32_1 : i32, i32, i32
  }
  func.func @transform_4(%arg0: i32) -> (i32, i32) {
    %c0_i32 = arith.constant 0 : i32
    %c0_i32_0 = arith.constant 0 : i32
    %c0_i32_1 = arith.constant 0 : i32
    return %c0_i32, %c0_i32_0 : i32, i32
  }
  func.func @transform_5(%arg0: i32) -> (i32, i32) {
    %c0_i32 = arith.constant 0 : i32
    %c0_i32_0 = arith.constant 0 : i32
    %c0_i32_1 = arith.constant 0 : i32
    return %c0_i32, %c0_i32_0 : i32, i32
  }
}

</mosaic_0001>

<bundles_post_ra>
// kernel: multi_head_differ_attention.1
= control target key start
LH: loop header
LB: loop body
LE: loop exit
PB: predicated region body
PF: predicated region fallthrough
CT: control target
= control target key end

     0   :  { %11 = vsyncpa [#allocation4], 0  ;;  %s4561_s0 = inlined_call_operand.hbm [shape: f32[32,64], index: 0, kind: input, shape index: {}]   ;;  %s4562_s1 = inlined_call_operand.hbm [shape: f32[64,320], index: 1, kind: input, shape index: {}]   ;;  %s4563_s2 = inlined_call_operand.vmem [shape: f32[1,320], index: 2, kind: input, shape index: {}]   ;;  %s4564_s3 = inlined_call_operand.hbm [shape: f32[4,32,64], index: 3, kind: input, shape index: {}]   ;;  %s4565_s4 = inlined_call_operand.<no memory space> [shape: f32[1,1], index: 4, kind: input, shape index: {}]   ;;  %s4566_s5 = inlined_call_operand.vmem [shape: f32[16,128], index: 5, kind: output, shape index: {}]  }
   0x1   :  { %12 = vsyncpa [#allocation6], 0  ;;  %s3930_s18 = smov [#allocation5]   ;;  %s3860_s22 = scalar_lea.hbm %s4562_s1, 3072 }
   0x2   :  { %s30_s19 = sshll.u32 %s3930_s18, 4  ;;  %p3861_p0 = scmp.ne.s32.totalorder %s4562_s1, %s3860_s22  ;;  %s31_s19 = int_to_ptr.vmem [resolvable:$true] %s30_s19 }
   0x3   :  { %p3864_p1 = scmp.lt.u32.totalorder %s3860_s22, %s4562_s1 }
   0x5   :  { %p3866_p2 = pnand %p3864_p1, %p3861_p0 }
   0x7   :  { %3869 = shalt.err (!%p3866_p2)
}
   0x8   :  { %s3870_s27 = scalar_lea.vmem %s31_s19, 3072  ;;  %p3875_p4 = scmp.lt.s32.totalorder %s31_s19, %s31_s19 }
   0x9   :  { %p3871_p3 = scmp.ne.s32.totalorder %s31_s19, %s3870_s27  ;;  %p3876_p5 = scmp.lt.s32.totalorder %s3870_s27, %s3870_s27 }
   0xb   :  { %p3877_p6 = por %p3876_p5, %p3875_p4 }
   0xd   :  { %p3878_p7 = pnand %p3877_p6, %p3871_p3 }
   0xf   :  { %3881 = shalt.err (!%p3878_p7)
}
  0x10   :  { %s3931_s28 = smov 384   ;;  %s3932_s29 = smov 24  }
  0x11   :  { %36 = dma.hbm_to_vmem [thread:$0]  %s4562_s1, 3072, %s31_s19, [#allocation6], %s3931_s28, %s3931_s28, %s3932_s29  }
  0x12   :  { %s3933_s7 = smov [#allocation3]   ;;  %s3882_s11 = scalar_lea.hbm %s4561_s0, 512 }
  0x13   :  { %s18_s8 = sshll.u32 %s3933_s7, 4  ;;  %p3883_p8 = scmp.ne.s32.totalorder %s4561_s0, %s3882_s11  ;;  %s19_s8 = int_to_ptr.vmem [resolvable:$true] %s18_s8 }
  0x14   :  { %p3886_p9 = scmp.lt.u32.totalorder %s3882_s11, %s4561_s0 }
  0x16   :  { %p3888_p10 = pnand %p3886_p9, %p3883_p8 }
  0x18   :  { %3891 = shalt.err (!%p3888_p10)
}
  0x19   :  { %s3892_s16 = scalar_lea.vmem %s19_s8, 512  ;;  %p3897_p12 = scmp.lt.s32.totalorder %s19_s8, %s19_s8 }
  0x1a   :  { %p3893_p11 = scmp.ne.s32.totalorder %s19_s8, %s3892_s16  ;;  %p3898_p13 = scmp.lt.s32.totalorder %s3892_s16, %s3892_s16 }
  0x1c   :  { %p3899_p0 = por %p3898_p13, %p3897_p12 }
  0x1e   :  { %p3900_p1 = pnand %p3899_p0, %p3893_p11 }
  0x20   :  { %3903 = shalt.err (!%p3900_p1)
}
  0x21   :  { %s3934_s1 = smov 128   ;;  %s3935_s17 = smov 8  }
  0x22   :  { %24 = dma.hbm_to_vmem [thread:$0]  %s4561_s0, 512, %s19_s8, [#allocation4], %s3934_s1, %s3934_s1, %s3935_s17  }
  0x23   :  { %s3936_s20 = smov [#allocation7]   ;;  %s3904_s24 = scalar_lea.hbm %s4564_s3, 2048 }
  0x24   :  { %s44_s21 = sshll.u32 %s3936_s20, 4  ;;  %p3905_p2 = scmp.ne.s32.totalorder %s4564_s3, %s3904_s24  ;;  %s45_s21 = int_to_ptr.vmem [resolvable:$true] %s44_s21 }
  0x25   :  { %p3908_p3 = scmp.lt.u32.totalorder %s3904_s24, %s4564_s3 }
  0x27   :  { %p3910_p4 = pnand %p3908_p3, %p3905_p2 }
  0x29   :  { %3913 = shalt.err (!%p3910_p4)
}
  0x2a   :  { %s3914_s30 = scalar_lea.vmem %s45_s21, 2048  ;;  %p3919_p6 = scmp.lt.s32.totalorder %s45_s21, %s45_s21 }
  0x2b   :  { %p3915_p5 = scmp.ne.s32.totalorder %s45_s21, %s3914_s30  ;;  %p3920_p7 = scmp.lt.s32.totalorder %s3914_s30, %s3914_s30 }
  0x2d   :  { %p3921_p8 = por %p3920_p7, %p3919_p6 }
  0x2f   :  { %p3922_p9 = pnand %p3921_p8, %p3915_p5 }
  0x31   :  { %3925 = shalt.err (!%p3922_p9)
}
  0x32   :  { %50 = dma.hbm_to_vmem [thread:$0]  %s4564_s3, 2048, %s45_s21, [#allocation6], %s3934_s1, %s3934_s1, %s3935_s17  }
  0x33   :  { %3926 = dma.done.wait [#allocation4], 512  }
  0x34   :  { %3927 = vsyncadd [#allocation4], 4294966784 }
  0x35   :  { %3928 = dma.done.wait [#allocation6], 5120  }
  0x36   :  { %3929 = vsyncadd [#allocation6], 4294962176  ;;  %v3937_v0 = vmov 0.0   ;;  %v67_v1 = vld [vmem:[#allocation5 + $0x8] sm:$0xff]  ;;  %v70_v2 = vld [vmem:[#allocation5 + $0x20] sm:$0xff]  ;;  %vm107_vm0 = vcmask 523264   ;;  %v92_v43 = vlaneseq }
  0x37   :  { %184 = vmatprep.mubr.f32.mxu0 %v3937_v0  ;;  %v68_v3 = vld [vmem:[#allocation5 + $0x10] sm:$0xff]  ;;  %v3441_v4 = vpack.c.bf16 %v70_v2, %v67_v1  ;;  %v71_v5 = vld [vmem:[#allocation5 + $0x28] sm:$0xff]  ;;  %v66_v6 = vld [vmem:[#allocation5] sm:$0xff]  ;;  %s3938_s3 = smov 64   ;;  %vm415_vm1 = vcmask 64512   ;;  %s3940_s9 = smov 120  }
  0x38   :  { %v69_v7 = vld [vmem:[#allocation5 + $0x18] sm:$0xff]  ;;  %v3457_v8 = vpack.c.bf16 %v71_v5, %v68_v3  ;;  %v76_v11 = vld [vmem:[#allocation5 + $0x50] sm:$0xff]  ;;  %v74_v12 = vld [vmem:[#allocation5 + $0x40] sm:$0xff]  ;;  %v4032_v44 = vshrl.u32 %v92_v43, 7  ;;  %vm503_vm5 = vcmask 130048   ;;  %s3941_s10 = smov 40  }
  0x39   :  { %v3443_v9 = vpack.c.bf16 %v69_v7, %v66_v6  ;;  %v73_v10 = vld [vmem:[#allocation5 + $0x38] sm:$0xff]  ;;  %3442 = vmatprep.subr.bf16.mxu0 %v3441_v4  ;;  %v72_v15 = vld [vmem:[#allocation5 + $0x30] sm:$0xff]  ;;  %v75_v16 = vld [vmem:[#allocation5 + $0x48] sm:$0xff]  ;;  %s3942_s11 = smov 104   ;;  %s3943_s12 = smov 112   ;;  %vm3030_vm6 = vcmask 261120  }
  0x3a   :  { %v3445_v13 = vpack.c.bf16 %v76_v11, %v73_v10  ;;  %v77_v14 = vld [vmem:[#allocation5 + $0x58] sm:$0xff]  ;;  %3458 = vmatprep.subr.bf16.mxu1 %v3457_v8  ;;  %v3447_v18 = vpack.c.bf16 %v75_v16, %v72_v15  ;;  %v79_v19 = vld [vmem:[#allocation5 + $0x68] sm:$0xff]  ;;  %v82_v20 = vld [vmem:[#allocation5 + $0x80] sm:$0xff]  ;;  %v102_v45 = vsub.s32 2, %v4032_v44  ;;  %v98_v47 = vsub.s32 1, %v4032_v44  ;;  %s3944_s13 = smov 48  }
  0x3b   :  { %3444 = vmatpush1.bf16.msra.mxu0 %v3443_v9  ;;  %v3461_v17 = vpack.c.bf16 %v77_v14, %v74_v12  ;;  %v80_v21 = vld [vmem:[#allocation5 + $0x70] sm:$0xff]  ;;  %3460 = vmatpush3.bf16.msra.mxu1 %v3457_v8  ;;  %v3449_v22 = vpack.c.bf16 %v82_v20, %v79_v19  ;;  %v83_v23 = vld [vmem:[#allocation5 + $0x88] sm:$0xff]  ;;  %v78_v24 = vld [vmem:[#allocation5 + $0x60] sm:$0xff]  ;;  %v94_v8 = vsub.s32 0, %v4032_v44  ;;  %s3946_s16 = smov 88   ;;  %s3947_s1 = smov 96  }
  0x3c   :  { %3446 = vmatprep.subr.bf16.mxu0 %v3445_v13  ;;  %v81_v25 = vld [vmem:[#allocation5 + $0x78] sm:$0xff]  ;;  %v3465_v26 = vpack.c.bf16 %v83_v23, %v80_v21  ;;  %v88_v28 = vld [vmem:[#allocation5 + $0xb0] sm:$0xff]  ;;  %v86_v29 = vld [vmem:[#allocation5 + $0xa0] sm:$0xff]  ;;  %s3948_s18 = smov 16   ;;  %s3949_s19 = smov 72   ;;  %vm3033_vm7 = vcmask 392192  }
  0x3d   :  { %3462 = vmatprep.subr.bf16.mxu1 %v3461_v17  ;;  %v85_v27 = vld [vmem:[#allocation5 + $0x98] sm:$0xff]  ;;  %v3451_v31 = vpack.c.bf16 %v81_v25, %v78_v24  ;;  %v62_v32 = vld [vmem:[#allocation3] sm:$0xff]  ;;  %v84_v35 = vld [vmem:[#allocation5 + $0x90] sm:$0xff]  ;;  %s3950_s20 = smov 80   ;;  %vm3038_vm8 = vcmask 654336   ;;  %vm3041_vm9 = vcmask 785408  }
  0x3e   :  { %v89_v30 = vld [vmem:[#allocation5 + $0xb8] sm:$0xff]  ;;  %v303_v33 = vld [vmem:[#allocation7 + $0x20] sm:$0xff]  ;;  %v3453_v34 = vpack.c.bf16 %v88_v28, %v85_v27  ;;  %v87_v36 = vld [vmem:[#allocation5 + $0xa8] sm:$0xff]  ;;  %3267 = vmatprep.mubr.msk.f32.mxu1 %vm107_vm0, %v62_v32  ;;  %vm3044_vm10 = vcmask 916480  }
  0x3f   :  { %3448 = vmatpush1.bf16.msra.mxu0 %v3447_v18  ;;  %3464 = vmatpush3.bf16.msra.mxu1 %v3461_v17  ;;  %v348_v37 = vld [vmem:[#allocation7 + $0x40] sm:$0xff]  ;;  %v3469_v38 = vpack.c.bf16 %v89_v30, %v86_v29  ;;  %v3455_v39 = vpack.c.bf16 %v87_v36, %v84_v35  ;;  %v304_v40 = vld [vmem:[#allocation7 + $0x28] sm:$0xff]  ;;  %v64_v48 = vld [vmem:[#allocation3 + $0x10] sm:$0xff] }
  0x40   :  { %3450 = vmatprep.subr.bf16.mxu0 %v3449_v22  ;;  %3466 = vmatprep.subr.bf16.mxu1 %v3465_v26  ;;  %v349_v41 = vld [vmem:[#allocation7 + $0x48] sm:$0xff]  ;;  %v90_v46 = vld [vmem:[%s4563_s2] sm:$0x7]  ;;  %v65_v50 = vld [vmem:[#allocation3 + $0x18] sm:$0xff]  ;;  %s3939_s2 = smov 56  }
  0x41   :  { %311 = vrot.lane.b32.xlu0 %v303_v33, %s3938_s3  ;;  %356 = vrot.lane.b32.xlu1 %v348_v37, %s3938_s3  ;;  %v63_v42 = vld [vmem:[#allocation3 + $0x8] sm:$0xff]  ;;  %v4039_v49 = vrot.slane %v90_v46, %v102_v45  ;;  %v4043_v52 = vrot.slane %v90_v46, %v98_v47  ;;  %v373_v59 = vld [vmem:[#allocation7 + $0x60] sm:$0xff]  ;;  %v4059_v10 = vrot.slane %v90_v46, %v94_v8  ;;  %vm4093_vm2 = vmpackc.low %vm415_vm1, %vm415_vm1 }
  0x42   :  { %v374_v55 = vld [vmem:[#allocation7 + $0x68] sm:$0xff]  ;;  %v294_v15 = vld [vmem:[#allocation7] sm:$0xff] }
  0x43   :  { %3452 = vmatpush1.bf16.msra.mxu0 %v3451_v31  ;;  %3468 = vmatpush3.bf16.msra.mxu1 %v3465_v26  ;;  %v295_v22 = vld [vmem:[#allocation7 + $0x8] sm:$0xff] }
  0x44   :  { %3454 = vmatprep.subr.bf16.mxu0 %v3453_v34  ;;  %3470 = vmatprep.subr.bf16.mxu1 %v3469_v38 }
  0x45   :  { %313 = vrot.lane.b32.xlu0 %v304_v40, %s3938_s3  ;;  %358 = vrot.lane.b32.xlu1 %v349_v41, %s3938_s3 }
  0x47   :  { %3456 = vmatpush1.bf16.msra.mxu0 %v3455_v39  ;;  %3472 = vmatpush3.bf16.msra.mxu1 %v3469_v38 }
  0x4a   :  { %3055 = vmatmul.mubr.msk.f32.vlgmr.msra.gmra.mrb[0].mxu0 %vm107_vm0, %v62_v32  ;;  %3268 = vmatmul.mubr.msk.f32.vlgmr.msra.gmra.mrb[0].mxu1 %vm107_vm0, %v63_v42 }
  0x4b   :  { %190 = vmatprep.mubr.f32.mxu0 %v3937_v0  ;;  %3270 = vmatprep.mubr.msk.f32.mxu1 %vm107_vm0, %v64_v48 }
  0x4e   :  { %3056 = vmatmul.mubr.msk.f32.gmra.mrb[2].mxu0 %vm107_vm0, %v63_v42  ;;  %3271 = vmatmul.mubr.msk.f32.gmra.mrb[2].mxu1 %vm107_vm0, %v65_v50 }
  0x4f   :  { %196 = vmatprep.mubr.f32.mxu0 %v3937_v0 }
  0x52   :  { %3057 = vmatmul.mubr.msk.f32.gmra.mrb[4].mxu0 %vm107_vm0, %v64_v48  ;;  %v404_v48 = vadd.s32 8, %v4032_v44 }
  0x53   :  { %202 = vmatprep.mubr.f32.mxu0 %v3937_v0 }
  0x56   :  { %3058 = vmatmul.mubr.msk.f32.gmra.mrb[6].mxu0 %vm107_vm0, %v65_v50  ;;  %v406_v50 = vand.u32 127, %v92_v43 }
  0x58   :  { %vm4111_vm3 = vcmp.gt.s32.totalorder %v406_v50, %v404_v48  ;;  %vm4116_vm4 = vcmp.gt.s32.totalorder %v406_v50, %v4032_v44 }
  0xb3   :  { %v312_v51 = vpop.permute.xlu0 %311  ;;  %v357_v9 = vpop.permute.xlu1 %356 }
  0xb7   :  { %v314_v3 = vpop.permute.xlu0 %313  ;;  %v359_v13 = vpop.permute.xlu1 %358 }
 0x11d   :  { %v186_v53 = vpop.f32.mrb[0].mxu0  ;;  %v3269_v54 = vpop.f32.mrb[0].mxu1 }
 0x11e   :  { %v188_v56 = vpop.f32.mrb[1].mxu0  ;;  %v281_v57 = vadd.f32 %v3269_v54, %v4039_v49  ;;  %v275_v58 = vpop.f32.mrb[1].mxu1  ;;  %v187_v12 = vadd.f32 %v186_v53, %v4059_v10 }
 0x11f   :  { %v276_v60 = vadd.f32 %v275_v58, %v4039_v49  ;;  %v189_v61 = vadd.f32 %v188_v56, %v4043_v52 }
 0x120   :  { %v378_v62 = vmul.f32 %v374_v55, %v281_v57  ;;  %v368_v16 = vmul.f32 %v357_v9, %v187_v12  ;;  %v298_v21 = vmul.f32 %v294_v15, %v187_v12 }
 0x121   :  { %v192_v63 = vpop.f32.mrb[2].mxu0  ;;  %v377_v1 = vmul.f32 %v373_v59, %v276_v60  ;;  %v323_v4 = vmul.f32 %v312_v51, %v189_v61  ;;  %v4083_v31 = vpop.f32.mrb[2].mxu1 }
 0x122   :  { %v194_v2 = vpop.f32.mrb[3].mxu0  ;;  %387 = vrot.lane.b32.xlu1 %v378_v62, %s3938_s3  ;;  %v193_v11 = vadd.f32 %v192_v63, %v4059_v10  ;;  %v4085_v32 = vpop.f32.mrb[3].mxu1 }
 0x123   :  { %v195_v0 = vadd.f32 %v194_v2, %v4043_v52  ;;  %385 = vrot.lane.b32.xlu0 %v377_v1, %s3938_s3 }
 0x124   :  { %v369_v14 = vmul.f32 %v359_v13, %v193_v11  ;;  %v299_v26 = vmul.f32 %v295_v22, %v193_v11 }
 0x125   :  { %v324_v5 = vmul.f32 %v314_v3, %v195_v0  ;;  %v3485_v6 = vpack.c.bf16 %v195_v0, %v189_v61  ;;  %v4054_v7 = vpack.i.bf16 %v195_v0, %v189_v61  ;;  %v4079_v29 = vpop.f32.mrb[4].mxu0 }
 0x126   :  { %v4081_v30 = vpop.f32.mrb[5].mxu0 }
 0x127   :  { %333 = vrot.lane.b32.xlu1 %v324_v5, %s3938_s3  ;;  %331 = vrot.lane.b32.xlu0 %v323_v4, %s3938_s3 }
 0x129   :  { %v4087_v33 = vpop.f32.mrb[6].mxu0 }
 0x12a   :  { %v4089_v34 = vpop.f32.mrb[7].mxu0 }
 0x194   :  { %v388_v17 = vpop.permute.xlu1 %387 }
 0x195   :  { %v398_v18 = vadd.f32 %v388_v17, %v369_v14  ;;  %v386_v19 = vpop.permute.xlu0 %385 }
 0x196   :  { %v397_v20 = vadd.f32 %v386_v19, %v368_v16 }
 0x198   :  { %v4063_v23 = vpack.i.bf16 %v398_v18, %v397_v20 }
 0x199   :  { %v334_v24 = vpop.permute.xlu1 %333  ;;  %v332_v25 = vpop.permute.xlu0 %331 }
 0x19a   :  { %v4065_v27 = vadd.f32 %v332_v25, %v298_v21  ;;  %3628 = vrot.lane.b32.xlu1 %v4063_v23, %s3938_s3  ;;  %3623 = vrot.lane.b32.xlu0 %v4063_v23, %s3939_s2  ;;  %v4071_v28 = vadd.f32 %v334_v24, %v299_v26 }
 0x19c   :  { %3277 = vmatprep.mubr.msk.f32.mxu1 %vm415_vm1, %v4065_v27 }
 0x19e   :  { %528 = vrot.lane.b32.xlu1 %v4071_v28, %s3940_s9  ;;  %526 = vrot.lane.b32.xlu0 %v4065_v27, %s3940_s9 }
 0x20c   :  { %v3629_v35 = vpop.permute.xlu1 %3628  ;;  %v3624_v36 = vpop.permute.xlu0 %3623 }
 0x20d   :  { %v3631_v37 = vunpack.i.h.bf16 %v3629_v35  ;;  %v3630_v38 = vunpack.i.l.bf16 %v3629_v35  ;;  %v3626_v39 = vunpack.i.h.bf16 %v3624_v36  ;;  %v3625_v40 = vunpack.i.l.bf16 %v3624_v36 }
 0x20f   :  { %v3473_v42 = vpack.c.bf16 %v3631_v37, %v3630_v38  ;;  %v3479_v45 = vpack.c.bf16 %v3626_v39, %v3625_v40 }
 0x210   :  { %v527_v46 = vpop.permute.xlu0 %526  ;;  %v529_v47 = vpop.permute.xlu1 %528 }
 0x211   :  { %3475 = vmatprep.subr.msk.bf16.mxu1 %vm4093_vm2, %v3473_v42  ;;  %3481 = vmatprep.subr.msk.bf16.mxu0 %vm4093_vm2, %v3479_v45 }
 0x212   :  { %3284 = vmatprep.mubr.msk.f32.mxu0 %vm415_vm1, %v527_v46  ;;  %3478 = vmatpush3.bf16.xpose.msk.msra.mxu1 %vm4093_vm2, %v3473_v42 }
 0x213   :  { %3484 = vmatpush3.bf16.xpose.msk.msra.mxu0 %vm4093_vm2, %v3479_v45  ;;  %3486 = vmatprep.subr.bf16.mxu1 %v3485_v6 }
 0x219   :  { %3278 = vmatmul.mubr.msk.f32.vlgmr.msra.gmra.mrb[4].mxu1 %vm415_vm1, %v4071_v28 }
 0x21a   :  { %3285 = vmatmul.mubr.msk.f32.vlgmr.msra.gmra.mrb[8].mxu0 %vm415_vm1, %v529_v47  ;;  %3488 = vmatpush3.bf16.msra.mxu1 %v3485_v6 }
 0x2ec   :  { %v3279_v54 = vpop.f32.mrb[4].mxu1 }
 0x2ed   :  { %v3286_v55 = vpop.f32.mrb[8].mxu0  ;;  %v492_v56 = vpop.f32.mrb[5].mxu1  ;;  %v502_v62 = vsel %vm4111_vm3, -inf, %v3279_v54  ;;  %v4157_v54 = vstv %s4565_s4  ;;  %s3945_s4 = smov 32  }
 0x2ee   :  { %v618_v57 = vsel %vm4111_vm3, -inf, %v3286_v55  ;;  %v608_v58 = vpop.f32.mrb[9].mxu0  ;;  %v501_v44 = vsel %vm4116_vm4, -inf, %v492_v56  ;;  %v507_v63 = vsel %vm503_vm5, %v502_v62, -inf }
 0x2ef   :  { %v617_v43 = vsel %vm4116_vm4, -inf, %v608_v58  ;;  %v622_v59 = vsel %vm503_vm5, %v618_v57, -inf  ;;  %v504_v61 = vsel %vm503_vm5, %v501_v44, -inf }
 0x2f0   :  { %623 = vmax.xlane.f32.xlu1 %v622_v59  ;;  %v619_v60 = vsel %vm503_vm5, %v617_v43, -inf }
 0x2f1   :  { %620 = vmax.xlane.f32.xlu0 %v619_v60 }
 0x2f5   :  { %505 = vmax.xlane.f32.xlu0 %v504_v61 }
 0x2f9   :  { %508 = vmax.xlane.f32.xlu0 %v507_v63 }
 0x301   :  { %3633 = vrot.lane.b32.xlu1 %v4063_v23, %s3941_s10 }
 0x305   :  { %842 = vrot.lane.b32.xlu1 %v4065_v27, %s3942_s11 }
 0x37d   :  { %v624_v1 = vpop.xlane.xlu1 %623 }
 0x37e   :  { %v626_v2 = vsub.f32 %v618_v57, %v624_v1  ;;  %v621_v3 = vpop.xlane.xlu0 %620 }
 0x37f   :  { %v625_v0 = vsub.f32 %v617_v43, %v621_v3 }
 0x380   :  { %v629_v4 = vmul.f32 1.442695, %v626_v2 }
 0x381   :  { %v627_v5 = vmul.f32 1.442695, %v625_v0  ;;  %v3634_v6 = vpop.permute.xlu1 %3633 }
 0x382   :  { %3732 = vpow2.f32 %v629_v4  ;;  %v3636_v8 = vunpack.i.h.bf16 %v3634_v6  ;;  %v3635_v9 = vunpack.i.l.bf16 %v3634_v6  ;;  %v506_v11 = vpop.xlane.xlu0 %505 }
 0x383   :  { %3734 = vpow2.f32 %v627_v5  ;;  %v510_v12 = vsub.f32 %v501_v44, %v506_v11 }
 0x384   :  { %v3495_v13 = vpack.c.bf16 %v3636_v8, %v3635_v9 }
 0x385   :  { %v512_v14 = vmul.f32 1.442695, %v510_v12  ;;  %v843_v15 = vpop.permute.xlu1 %842 }
 0x386   :  { %3497 = vmatprep.subr.msk.bf16.mxu0 %vm4093_vm2, %v3495_v13  ;;  %3305 = vmatprep.mubr.msk.f32.mxu0 %vm415_vm1, %v843_v15  ;;  %v509_v16 = vpop.xlane.xlu0 %508 }
 0x387   :  { %3736 = vpow2.f32 %v512_v14  ;;  %v511_v17 = vsub.f32 %v502_v62, %v509_v16  ;;  %3500 = vmatpush3.bf16.xpose.msk.msra.mxu0 %vm4093_vm2, %v3495_v13 }
 0x389   :  { %v514_v18 = vmul.f32 1.442695, %v511_v17 }
 0x38b   :  { %3738 = vpow2.f32 %v514_v18 }
 0x38c   :  { %v3733_v19 = vpop.eup %3732 }
 0x38d   :  { %v3735_v20 = vpop.eup %3734  ;;  %v634_v21 = vsel %vm503_vm5, %v3733_v19, 0.0 }
 0x38e   :  { %635 = vadd.xlane.f32.xlu0 %v634_v21  ;;  %v631_v22 = vsel %vm503_vm5, %v3735_v20, 0.0 }
 0x38f   :  { %632 = vadd.xlane.f32.xlu1 %v631_v22 }
 0x391   :  { %v3737_v24 = vpop.eup %3736 }
 0x392   :  { %v516_v25 = vsel %vm503_vm5, %v3737_v24, 0.0 }
 0x393   :  { %517 = vadd.xlane.f32.xlu1 %v516_v25 }
 0x395   :  { %v3739_v26 = vpop.eup %3738 }
 0x396   :  { %v519_v35 = vsel %vm503_vm5, %v3739_v26, 0.0 }
 0x397   :  { %520 = vadd.xlane.f32.xlu0 %v519_v35 }
 0x3a4   :  { %844 = vrot.lane.b32.xlu1 %v4071_v28, %s3942_s11 }
 0x3a8   :  { %729 = vrot.lane.b32.xlu1 %v4071_v28, %s3943_s12 }
 0x3ad   :  { %3638 = vrot.lane.b32.xlu0 %v4063_v23, %s3944_s13 }
 0x3b1   :  { %727 = vrot.lane.b32.xlu0 %v4065_v27, %s3943_s12 }
 0x41b   :  { %v636_v36 = vpop.xlane.xlu0 %635 }
 0x41c   :  { %v633_v37 = vpop.xlane.xlu1 %632 }
 0x41d   :  { %3740 = vrcp.f32 %v633_v37 }
 0x41e   :  { %3742 = vrcp.f32 %v636_v36 }
 0x420   :  { %v518_v38 = vpop.xlane.xlu1 %517 }
 0x421   :  { %3744 = vrcp.f32 %v518_v38 }
 0x424   :  { %v845_v39 = vpop.permute.xlu1 %844  ;;  %v521_v40 = vpop.xlane.xlu0 %520 }
 0x425   :  { %3746 = vrcp.f32 %v521_v40  ;;  %3306 = vmatmul.mubr.msk.f32.vlgmr.msra.gmra.mrb[10].mxu0 %vm415_vm1, %v845_v39 }
 0x427   :  { %v3741_v42 = vpop.eup %3740 }
 0x428   :  { %v3639_v45 = vpop.permute.xlu0 %3638  ;;  %v639_v46 = vmul.f32 %v3741_v42, %v3735_v20  ;;  %v3743_v47 = vpop.eup %3742 }
 0x429   :  { %v3641_v48 = vunpack.i.h.bf16 %v3639_v45  ;;  %v3640_v50 = vunpack.i.l.bf16 %v3639_v45  ;;  %v640_v57 = vmul.f32 %v3743_v47, %v3733_v19  ;;  %v730_v1 = vpop.permute.xlu1 %729 }
 0x42a   :  { %v642_v43 = vmul.f32 %v4157_v54, %v639_v46 }
 0x42b   :  { %v3745_v55 = vpop.eup %3744  ;;  %v3489_v56 = vpack.c.bf16 %v3641_v48, %v3640_v50  ;;  %v643_v61 = vmul.f32 %v4157_v54, %v640_v57 }
 0x42c   :  { %v524_v58 = vmul.f32 %v3745_v55, %v3737_v24  ;;  %v728_v63 = vpop.permute.xlu0 %727 }
 0x42d   :  { %3491 = vmatprep.subr.msk.bf16.mxu1 %vm4093_vm2, %v3489_v56 }
 0x42e   :  { %v644_v59 = vsub.f32 %v524_v58, %v642_v43 }
 0x42f   :  { %v3747_v60 = vpop.eup %3746 }
 0x430   :  { %v525_v44 = vmul.f32 %v3747_v60, %v3739_v26  ;;  %3291 = vmatprep.mubr.msk.f32.mxu1 %vm503_vm5, %v644_v59 }
 0x432   :  { %v645_v62 = vsub.f32 %v525_v44, %v643_v61 }
 0x434   :  { %3292 = vmatmul.mubr.msk.f32.vlgmr.msra.gmra.mrb[6].mxu1 %vm503_vm5, %v645_v62 }
 0x435   :  { %3494 = vmatpush3.bf16.xpose.msk.msra.mxu1 %vm4093_vm2, %v3489_v56  ;;  %3298 = vmatprep.mubr.msk.f32.mxu1 %vm415_vm1, %v728_v63 }
 0x43c   :  { %3299 = vmatmul.mubr.msk.f32.vlgmr.msra.gmra.mrb[8].mxu1 %vm415_vm1, %v730_v1 }
 0x4f8   :  { %v3307_v2 = vpop.f32.mrb[10].mxu0 }
 0x4f9   :  { %v934_v3 = vsel %vm4111_vm3, -inf, %v3307_v2  ;;  %v924_v0 = vpop.f32.mrb[11].mxu0 }
 0x4fa   :  { %v933_v4 = vsel %vm4116_vm4, -inf, %v924_v0  ;;  %v938_v5 = vsel %vm503_vm5, %v934_v3, -inf }
 0x4fb   :  { %939 = vmax.xlane.f32.xlu1 %v938_v5  ;;  %v935_v6 = vsel %vm503_vm5, %v933_v4, -inf }
 0x4fc   :  { %936 = vmax.xlane.f32.xlu0 %v935_v6 }
 0x507   :  { %v4175_v8 = vpop.f32.mrb[6].mxu1 }
 0x508   :  { %v4177_v9 = vpop.f32.mrb[7].mxu1 }
 0x50f   :  { %v3300_v11 = vpop.f32.mrb[8].mxu1 }
 0x510   :  { %v809_v12 = vpop.f32.mrb[9].mxu1  ;;  %v819_v15 = vsel %vm4111_vm3, -inf, %v3300_v11 }
 0x511   :  { %v818_v13 = vsel %vm4116_vm4, -inf, %v809_v12  ;;  %v823_v16 = vsel %vm503_vm5, %v819_v15, -inf }
 0x512   :  { %v820_v14 = vsel %vm503_vm5, %v818_v13, -inf }
 0x513   :  { %821 = vmax.xlane.f32.xlu0 %v820_v14 }
 0x517   :  { %824 = vmax.xlane.f32.xlu0 %v823_v16 }
 0x588   :  { %v940_v17 = vpop.xlane.xlu1 %939 }
 0x589   :  { %v942_v18 = vsub.f32 %v934_v3, %v940_v17  ;;  %v937_v19 = vpop.xlane.xlu0 %936 }
 0x58a   :  { %v941_v20 = vsub.f32 %v933_v4, %v937_v19 }
 0x58b   :  { %v945_v21 = vmul.f32 1.442695, %v942_v18 }
 0x58c   :  { %v943_v22 = vmul.f32 1.442695, %v941_v20 }
 0x58d   :  { %3748 = vpow2.f32 %v945_v21 }
 0x58e   :  { %3750 = vpow2.f32 %v943_v22 }
 0x597   :  { %v3749_v24 = vpop.eup %3748 }
 0x598   :  { %v3751_v25 = vpop.eup %3750  ;;  %v950_v26 = vsel %vm503_vm5, %v3749_v24, 0.0 }
 0x599   :  { %951 = vadd.xlane.f32.xlu0 %v950_v26  ;;  %v947_v35 = vsel %vm503_vm5, %v3751_v25, 0.0 }
 0x59a   :  { %948 = vadd.xlane.f32.xlu1 %v947_v35 }
 0x5a0   :  { %v822_v36 = vpop.xlane.xlu0 %821 }
 0x5a1   :  { %v826_v45 = vsub.f32 %v818_v13, %v822_v36 }
 0x5a3   :  { %v828_v46 = vmul.f32 1.442695, %v826_v45 }
 0x5a4   :  { %v825_v37 = vpop.xlane.xlu0 %824 }
 0x5a5   :  { %v827_v38 = vsub.f32 %v819_v15, %v825_v37 }
 0x5a7   :  { %v830_v39 = vmul.f32 1.442695, %v827_v38 }
 0x5a9   :  { %3752 = vpow2.f32 %v830_v39 }
 0x5aa   :  { %3754 = vpow2.f32 %v828_v46 }
 0x5ab   :  { %3643 = vrot.lane.b32.xlu1 %v4054_v7, %s3943_s12 }
 0x5af   :  { %3653 = vrot.lane.b32.xlu1 %v4063_v23, %s3945_s4 }
 0x5b3   :  { %v3753_v40 = vpop.eup %3752 }
 0x5b4   :  { %v835_v42 = vsel %vm503_vm5, %v3753_v40, 0.0  ;;  %v3755_v47 = vpop.eup %3754 }
 0x5b5   :  { %836 = vadd.xlane.f32.xlu0 %v835_v42  ;;  %v832_v48 = vsel %vm503_vm5, %v3755_v47, 0.0 }
 0x5cb   :  { %3648 = vrot.lane.b32.xlu0 %v4063_v23, %s3932_s29 }
 0x5cf   :  { %1167 = vrot.lane.b32.xlu0 %v4071_v28, %s3946_s16 }
 0x5d3   :  { %1052 = vrot.lane.b32.xlu0 %v4071_v28, %s3947_s1  ;;  %833 = vadd.xlane.f32.xlu1 %v832_v48 }
 0x5e4   :  { %1165 = vrot.lane.b32.xlu1 %v4065_v27, %s3946_s16 }
 0x5e8   :  { %1050 = vrot.lane.b32.xlu1 %v4065_v27, %s3947_s1 }
 0x626   :  { %v952_v61 = vpop.xlane.xlu0 %951 }
 0x627   :  { %v949_v50 = vpop.xlane.xlu1 %948 }
 0x628   :  { %3756 = vrcp.f32 %v949_v50 }
 0x629   :  { %3758 = vrcp.f32 %v952_v61 }
 0x62b   :  { %v3644_v55 = vpop.permute.xlu1 %3643 }
 0x62c   :  { %v3646_v56 = vunpack.i.h.bf16 %v3644_v55  ;;  %v3645_v57 = vunpack.i.l.bf16 %v3644_v55 }
 0x62e   :  { %v3501_v58 = vpack.c.bf16 %v3646_v56, %v3645_v57 }
 0x62f   :  { %v3654_v43 = vpop.permute.xlu1 %3653 }
 0x630   :  { %v3656_v59 = vunpack.i.h.bf16 %v3654_v43  ;;  %v3655_v60 = vunpack.i.l.bf16 %v3654_v43  ;;  %3502 = vmatprep.subr.bf16.mxu1 %v3501_v58 }
 0x631   :  { %3504 = vmatpush3.bf16.msra.mxu1 %v3501_v58 }
 0x632   :  { %v3505_v44 = vpack.c.bf16 %v3656_v59, %v3655_v60  ;;  %v3757_v6 = vpop.eup %3756 }
 0x633   :  { %v3759_v11 = vpop.eup %3758  ;;  %v955_v14 = vmul.f32 %v3757_v6, %v3751_v25 }
 0x634   :  { %3507 = vmatprep.subr.msk.bf16.mxu0 %vm4093_vm2, %v3505_v44  ;;  %v956_v15 = vmul.f32 %v3759_v11, %v3749_v24 }
 0x635   :  { %3510 = vmatpush3.bf16.xpose.msk.msra.mxu0 %vm4093_vm2, %v3505_v44  ;;  %v957_v20 = vmul.f32 %v955_v14, %v4157_v54 }
 0x636   :  { %v958_v21 = vmul.f32 %v956_v15, %v4157_v54 }
 0x642   :  { %v837_v62 = vpop.xlane.xlu0 %836 }
 0x643   :  { %3760 = vrcp.f32 %v837_v62 }
 0x646   :  { %v3649_v63 = vpop.permute.xlu0 %3648 }
 0x647   :  { %v3651_v1 = vunpack.i.h.bf16 %v3649_v63  ;;  %v3650_v2 = vunpack.i.l.bf16 %v3649_v63 }
 0x649   :  { %v3511_v3 = vpack.c.bf16 %v3651_v1, %v3650_v2 }
 0x64a   :  { %v1168_v4 = vpop.permute.xlu0 %1167 }
 0x64b   :  { %3513 = vmatprep.subr.msk.bf16.mxu1 %vm4093_vm2, %v3511_v3 }
 0x64d   :  { %v3761_v12 = vpop.eup %3760 }
 0x64e   :  { %v1053_v16 = vpop.permute.xlu0 %1052  ;;  %v841_v18 = vmul.f32 %v3761_v12, %v3753_v40 }
 0x650   :  { %v960_v26 = vsub.f32 %v841_v18, %v958_v21 }
 0x660   :  { %v834_v0 = vpop.xlane.xlu1 %833 }
 0x661   :  { %3762 = vrcp.f32 %v834_v0 }
 0x664   :  { %v1166_v5 = vpop.permute.xlu1 %1165 }
 0x668   :  { %v1051_v13 = vpop.permute.xlu1 %1050 }
 0x669   :  { %3319 = vmatprep.mubr.msk.f32.mxu0 %vm415_vm1, %v1051_v13 }
 0x66a   :  { %3320 = vmatmul.mubr.msk.f32.vlgmr.msra.gmra.mrb[12].mxu0 %vm415_vm1, %v1053_v16 }
 0x66b   :  { %v3763_v17 = vpop.eup %3762 }
 0x66c   :  { %v840_v19 = vmul.f32 %v3763_v17, %v3755_v47 }
 0x66e   :  { %v959_v22 = vsub.f32 %v840_v19, %v957_v20 }
 0x670   :  { %3312 = vmatprep.mubr.msk.f32.mxu1 %vm503_vm5, %v959_v22 }
 0x671   :  { %3313 = vmatmul.mubr.msk.f32.vlgmr.msra.gmra.mrb[10].mxu1 %vm503_vm5, %v960_v26 }
 0x672   :  { %3516 = vmatpush3.bf16.xpose.msk.msra.mxu1 %vm4093_vm2, %v3511_v3  ;;  %3326 = vmatprep.mubr.msk.f32.mxu1 %vm415_vm1, %v1166_v5 }
 0x679   :  { %3327 = vmatmul.mubr.msk.f32.vlgmr.msra.gmra.mrb[12].mxu1 %vm415_vm1, %v1168_v4 }
 0x73d   :  { %v3321_v24 = vpop.f32.mrb[12].mxu0 }
 0x73e   :  { %v1132_v25 = vpop.f32.mrb[13].mxu0  ;;  %v1142_v47 = vsel %vm4111_vm3, -inf, %v3321_v24 }
 0x73f   :  { %v1141_v45 = vsel %vm4116_vm4, -inf, %v1132_v25  ;;  %v1146_v50 = vsel %vm503_vm5, %v1142_v47, -inf }
 0x740   :  { %v1143_v48 = vsel %vm503_vm5, %v1141_v45, -inf }
 0x744   :  { %v4219_v35 = vpop.f32.mrb[10].mxu1 }
 0x745   :  { %v4221_v36 = vpop.f32.mrb[11].mxu1 }
 0x74c   :  { %v3328_v37 = vpop.f32.mrb[12].mxu1 }
 0x74d   :  { %v1257_v38 = vsel %vm4111_vm3, -inf, %v3328_v37  ;;  %v1247_v39 = vpop.f32.mrb[13].mxu1 }
 0x74e   :  { %v1256_v40 = vsel %vm4116_vm4, -inf, %v1247_v39  ;;  %v1261_v42 = vsel %vm503_vm5, %v1257_v38, -inf }
 0x74f   :  { %1262 = vmax.xlane.f32.xlu0 %v1261_v42  ;;  %v1258_v46 = vsel %vm503_vm5, %v1256_v40, -inf }
 0x750   :  { %1259 = vmax.xlane.f32.xlu1 %v1258_v46 }
 0x753   :  { %1144 = vmax.xlane.f32.xlu0 %v1143_v48 }
 0x754   :  { %1147 = vmax.xlane.f32.xlu1 %v1146_v50 }
 0x7dc   :  { %v1263_v55 = vpop.xlane.xlu0 %1262 }
 0x7dd   :  { %v1260_v56 = vpop.xlane.xlu1 %1259  ;;  %v1265_v58 = vsub.f32 %v1257_v38, %v1263_v55 }
 0x7de   :  { %v1264_v57 = vsub.f32 %v1256_v40, %v1260_v56 }
 0x7df   :  { %v1268_v63 = vmul.f32 1.442695, %v1265_v58 }
 0x7e0   :  { %v1145_v43 = vpop.xlane.xlu0 %1144  ;;  %v1266_v61 = vmul.f32 1.442695, %v1264_v57 }
 0x7e1   :  { %v1149_v59 = vsub.f32 %v1141_v45, %v1145_v43  ;;  %v1148_v60 = vpop.xlane.xlu1 %1147 }
 0x7e2   :  { %v1150_v44 = vsub.f32 %v1142_v47, %v1148_v60 }
 0x7e3   :  { %v1151_v62 = vmul.f32 1.442695, %v1149_v59 }
 0x7e4   :  { %v1153_v1 = vmul.f32 1.442695, %v1150_v44 }
 0x7e5   :  { %3764 = vpow2.f32 %v1151_v62 }
 0x7e6   :  { %3766 = vpow2.f32 %v1153_v1 }
 0x7e7   :  { %3768 = vpow2.f32 %v1266_v61 }
 0x7e8   :  { %3770 = vpow2.f32 %v1268_v63 }
 0x7ef   :  { %v3765_v2 = vpop.eup %3764 }
 0x7f0   :  { %v3767_v3 = vpop.eup %3766  ;;  %v1155_v0 = vsel %vm503_vm5, %v3765_v2, 0.0 }
 0x7f1   :  { %v3769_v4 = vpop.eup %3768  ;;  %1156 = vadd.xlane.f32.xlu0 %v1155_v0  ;;  %v1158_v5 = vsel %vm503_vm5, %v3767_v3, 0.0 }
 0x7f2   :  { %v3771_v6 = vpop.eup %3770  ;;  %1159 = vadd.xlane.f32.xlu1 %v1158_v5  ;;  %v1270_v11 = vsel %vm503_vm5, %v3769_v4, 0.0 }
 0x7f3   :  { %v1273_v12 = vsel %vm503_vm5, %v3771_v6, 0.0 }
 0x7f5   :  { %1271 = vadd.xlane.f32.xlu0 %v1270_v11 }
 0x7f6   :  { %1274 = vadd.xlane.f32.xlu1 %v1273_v12 }
 0x807   :  { %3663 = vrot.lane.b32.xlu1 %v4063_v23, %s3935_s17 }
 0x80b   :  { %3658 = vrot.lane.b32.xlu0 %v4054_v7, %s3947_s1  ;;  %3668 = vrot.lane.b32.xlu1 %v4063_v23, %s3948_s18 }
 0x80f   :  { %1486 = vrot.lane.b32.xlu0 %v4065_v27, %s3949_s19  ;;  %1488 = vrot.lane.b32.xlu1 %v4071_v28, %s3949_s19 }
 0x813   :  { %1371 = vrot.lane.b32.xlu0 %v4065_v27, %s3950_s20  ;;  %1373 = vrot.lane.b32.xlu1 %v4071_v28, %s3950_s20 }
 0x87e   :  { %v1157_v13 = vpop.xlane.xlu0 %1156 }
 0x87f   :  { %v1160_v14 = vpop.xlane.xlu1 %1159  ;;  %3772 = vrcp.f32 %v1157_v13  ;;  %v305_v13 = vld [vmem:[#allocation7 + $0x30] sm:$0xff] }
 0x880   :  { %3774 = vrcp.f32 %v1160_v14  ;;  %v350_v14 = vld [vmem:[#allocation7 + $0x50] sm:$0xff] }
 0x882   :  { %v1272_v15 = vpop.xlane.xlu0 %1271 }
 0x883   :  { %3776 = vrcp.f32 %v1272_v15  ;;  %v1275_v23 = vpop.xlane.xlu1 %1274  ;;  %v351_v15 = vld [vmem:[#allocation7 + $0x58] sm:$0xff] }
 0x884   :  { %3778 = vrcp.f32 %v1275_v23  ;;  %v291_v23 = vadd.f32 %v4083_v31, %v4039_v49  ;;  %v4297_v31 = vadd.f32 %v4081_v30, %v4043_v52  ;;  %v199_v30 = vadd.f32 %v4079_v29, %v4059_v10 }
 0x886   :  { %v3659_v16 = vpop.permute.xlu0 %3658 }
 0x887   :  { %v3661_v17 = vunpack.i.h.bf16 %v3659_v16  ;;  %v3660_v18 = vunpack.i.l.bf16 %v3659_v16  ;;  %v3664_v19 = vpop.permute.xlu1 %3663  ;;  %v306_v16 = vld [vmem:[#allocation7 + $0x38] sm:$0xff] }
 0x888   :  { %v3666_v20 = vunpack.i.h.bf16 %v3664_v19  ;;  %v3665_v21 = vunpack.i.l.bf16 %v3664_v19  ;;  %v375_v19 = vld [vmem:[#allocation7 + $0x70] sm:$0xff] }
 0x889   :  { %v3517_v22 = vpack.c.bf16 %v3661_v17, %v3660_v18  ;;  %v3773_v24 = vpop.eup %3772  ;;  %v376_v17 = vld [vmem:[#allocation7 + $0x78] sm:$0xff]  ;;  %v286_v18 = vadd.f32 %v4085_v32, %v4039_v49 }
 0x88a   :  { %v3527_v26 = vpack.c.bf16 %v3666_v20, %v3665_v21  ;;  %v1487_v27 = vpop.permute.xlu0 %1486  ;;  %v3775_v25 = vpop.eup %3774  ;;  %v1163_v48 = vmul.f32 %v3773_v24, %v3765_v2  ;;  %v380_v20 = vmul.f32 %v376_v17, %v291_v23 }
 0x88b   :  { %3518 = vmatprep.subr.bf16.mxu0 %v3517_v22  ;;  %v3669_v28 = vpop.permute.xlu1 %3668  ;;  %v1164_v55 = vmul.f32 %v3775_v25, %v3767_v3  ;;  %v379_v21 = vmul.f32 %v375_v19, %v286_v18 }
 0x88c   :  { %v3671_v37 = vunpack.i.h.bf16 %v3669_v28  ;;  %v3670_v38 = vunpack.i.l.bf16 %v3669_v28  ;;  %3520 = vmatpush3.bf16.msra.mxu0 %v3517_v22  ;;  %v4302_v28 = vadd.f32 %v4089_v34, %v4043_v52 }
 0x88d   :  { %v3777_v39 = vpop.eup %3776  ;;  %3529 = vmatprep.subr.msk.bf16.mxu0 %vm4093_vm2, %v3527_v26 }
 0x88e   :  { %v3779_v40 = vpop.eup %3778  ;;  %v3521_v42 = vpack.c.bf16 %v3671_v37, %v3670_v38  ;;  %v1372_v45 = vpop.permute.xlu0 %1371  ;;  %v1278_v46 = vmul.f32 %v3777_v39, %v3769_v4 }
 0x88f   :  { %v1279_v47 = vmul.f32 %v3779_v40, %v3771_v6  ;;  %3340 = vmatprep.mubr.msk.f32.mxu1 %vm415_vm1, %v1372_v45  ;;  %v1489_v57 = vpop.permute.xlu1 %1488  ;;  %v205_v40 = vadd.f32 %v4087_v33, %v4059_v10 }
 0x890   :  { %3523 = vmatprep.subr.msk.bf16.mxu1 %vm4093_vm2, %v3521_v42  ;;  %v1280_v50 = vmul.f32 %v1278_v46, %v4157_v54 }
 0x891   :  { %v1281_v56 = vmul.f32 %v1279_v47, %v4157_v54  ;;  %3526 = vmatpush3.bf16.xpose.msk.msra.mxu1 %vm4093_vm2, %v3521_v42 }
 0x892   :  { %v1282_v58 = vsub.f32 %v1163_v48, %v1280_v50 }
 0x893   :  { %v1283_v43 = vsub.f32 %v1164_v55, %v1281_v56  ;;  %v1374_v59 = vpop.permute.xlu1 %1373 }
 0x894   :  { %3333 = vmatprep.mubr.msk.f32.mxu0 %vm503_vm5, %v1282_v58 }
 0x895   :  { %3334 = vmatmul.mubr.msk.f32.vlgmr.msra.gmra.mrb[14].mxu0 %vm503_vm5, %v1283_v43 }
 0x896   :  { %3532 = vmatpush3.bf16.xpose.msk.msra.mxu0 %vm4093_vm2, %v3527_v26  ;;  %3347 = vmatprep.mubr.msk.f32.mxu0 %vm415_vm1, %v1487_v27 }
 0x898   :  { %3341 = vmatmul.mubr.msk.f32.vlgmr.msra.gmra.mrb[14].mxu1 %vm415_vm1, %v1374_v59 }
 0x89d   :  { %3348 = vmatmul.mubr.msk.f32.vlgmr.msra.gmra.mrb[16].mxu0 %vm415_vm1, %v1489_v57 }
 0x968   :  { %v4269_v60 = vpop.f32.mrb[14].mxu0 }
 0x969   :  { %v4271_v44 = vpop.f32.mrb[15].mxu0 }
 0x96b   :  { %v3342_v61 = vpop.f32.mrb[14].mxu1 }
 0x96c   :  { %v1453_v62 = vpop.f32.mrb[15].mxu1  ;;  %v1463_v2 = vsel %vm4111_vm3, -inf, %v3342_v61 }
 0x96d   :  { %v1462_v63 = vsel %vm4116_vm4, -inf, %v1453_v62  ;;  %v1467_v6 = vsel %vm503_vm5, %v1463_v2, -inf }
 0x96e   :  { %v1464_v1 = vsel %vm503_vm5, %v1462_v63, -inf }
 0x96f   :  { %1465 = vmax.xlane.f32.xlu0 %v1464_v1 }
 0x970   :  { %v3349_v3 = vpop.f32.mrb[16].mxu0 }
 0x971   :  { %v1578_v0 = vsel %vm4111_vm3, -inf, %v3349_v3  ;;  %v1568_v4 = vpop.f32.mrb[17].mxu0  ;;  %v296_v3 = vld [vmem:[#allocation7 + $0x10] sm:$0xff] }
 0x972   :  { %v1582_v5 = vsel %vm503_vm5, %v1578_v0, -inf  ;;  %v1577_v11 = vsel %vm4116_vm4, -inf, %v1568_v4 }
 0x973   :  { %1583 = vmax.xlane.f32.xlu1 %v1582_v5  ;;  %1468 = vmax.xlane.f32.xlu0 %v1467_v6  ;;  %v1579_v12 = vsel %vm503_vm5, %v1577_v11, -inf  ;;  %v297_v5 = vld [vmem:[#allocation7 + $0x18] sm:$0xff] }
 0x977   :  { %1580 = vmax.xlane.f32.xlu0 %v1579_v12 }
 0x984   :  { %315 = vrot.lane.b32.xlu1 %v305_v13, %s3938_s3 }
 0x988   :  { %360 = vrot.lane.b32.xlu1 %v350_v14, %s3938_s3 }
 0x98c   :  { %362 = vrot.lane.b32.xlu1 %v351_v15, %s3938_s3 }
 0x98d   :  { %317 = vrot.lane.b32.xlu0 %v306_v16, %s3938_s3 }
 0x990   :  { %391 = vrot.lane.b32.xlu1 %v380_v20, %s3938_s3 }
 0x991   :  { %389 = vrot.lane.b32.xlu0 %v379_v21, %s3938_s3 }
 0x9fc   :  { %v1466_v22 = vpop.xlane.xlu0 %1465 }
 0x9fd   :  { %v1470_v42 = vsub.f32 %v1462_v63, %v1466_v22 }
 0x9ff   :  { %v1472_v50 = vmul.f32 1.442695, %v1470_v42 }
 0xa00   :  { %v1584_v26 = vpop.xlane.xlu1 %1583  ;;  %v1469_v27 = vpop.xlane.xlu0 %1468 }
 0xa01   :  { %v1471_v56 = vsub.f32 %v1463_v2, %v1469_v27  ;;  %3780 = vpow2.f32 %v1472_v50  ;;  %v1586_v10 = vsub.f32 %v1578_v0, %v1584_v26  ;;  %v300_v0 = vmul.f32 %v296_v3, %v199_v30 }
 0xa03   :  { %v1474_v57 = vmul.f32 1.442695, %v1471_v56  ;;  %v1589_v33 = vmul.f32 1.442695, %v1586_v10 }
 0xa04   :  { %v316_v24 = vpop.permute.xlu1 %315  ;;  %v1581_v49 = vpop.xlane.xlu0 %1580 }
 0xa05   :  { %v325_v32 = vmul.f32 %v316_v24, %v4297_v31  ;;  %v1585_v29 = vsub.f32 %v1577_v11, %v1581_v49  ;;  %3782 = vpow2.f32 %v1474_v57  ;;  %v301_v11 = vmul.f32 %v297_v5, %v205_v40 }
 0xa07   :  { %335 = vrot.lane.b32.xlu0 %v325_v32, %s3938_s3  ;;  %v1587_v58 = vmul.f32 1.442695, %v1585_v29 }
 0xa08   :  { %v361_v25 = vpop.permute.xlu1 %360  ;;  %v318_v37 = vpop.permute.xlu0 %317 }
 0xa09   :  { %v326_v38 = vmul.f32 %v318_v37, %v4302_v28  ;;  %v370_v46 = vmul.f32 %v361_v25, %v199_v30  ;;  %3784 = vpow2.f32 %v1587_v58  ;;  %v3549_v30 = vpack.c.bf16 %v4302_v28, %v4297_v31 }
 0xa0a   :  { %3786 = vpow2.f32 %v1589_v33 }
 0xa0b   :  { %337 = vrot.lane.b32.xlu1 %v326_v38, %s3938_s3  ;;  %v3781_v43 = vpop.eup %3780 }
 0xa0c   :  { %v363_v39 = vpop.permute.xlu1 %362  ;;  %v390_v45 = vpop.permute.xlu0 %389  ;;  %v1476_v59 = vsel %vm503_vm5, %v3781_v43, 0.0 }
 0xa0d   :  { %v371_v52 = vmul.f32 %v363_v39, %v205_v40  ;;  %v399_v47 = vadd.f32 %v390_v45, %v370_v46 }
 0xa0f   :  { %3673 = vrot.lane.b32.xlu1 %v4054_v7, %s3950_s20  ;;  %v3783_v7 = vpop.eup %3782 }
 0xa10   :  { %v392_v34 = vpop.permute.xlu1 %391  ;;  %v1479_v61 = vsel %vm503_vm5, %v3783_v7, 0.0 }
 0xa11   :  { %v400_v48 = vadd.f32 %v392_v34, %v371_v52 }
 0xa13   :  { %v4313_v55 = vpack.i.bf16 %v400_v48, %v399_v47  ;;  %v3785_v62 = vpop.eup %3784 }
 0xa14   :  { %v1591_v63 = vsel %vm503_vm5, %v3785_v62, 0.0  ;;  %v3787_v1 = vpop.eup %3786 }
 0xa15   :  { %v1594_v2 = vsel %vm503_vm5, %v3787_v1, 0.0 }
 0xa26   :  { %1477 = vadd.xlane.f32.xlu0 %v1476_v59 }
 0xa2a   :  { %1480 = vadd.xlane.f32.xlu0 %v1479_v61 }
 0xa2e   :  { %1592 = vadd.xlane.f32.xlu0 %v1591_v63 }
 0xa33   :  { %1595 = vadd.xlane.f32.xlu1 %v1594_v2 }
 0xa44   :  { %3678 = vrot.lane.b32.xlu0 %v4313_v55, %s3939_s2  ;;  %3683 = vrot.lane.b32.xlu1 %v4313_v55, %s3938_s3 }
 0xa79   :  { %v336_v4 = vpop.permute.xlu0 %335 }
 0xa7a   :  { %v4323_v6 = vadd.f32 %v336_v4, %v300_v0 }
 0xa7c   :  { %1807 = vrot.lane.b32.xlu1 %v4323_v6, %s3940_s9  ;;  %3361 = vmatprep.mubr.msk.f32.mxu0 %vm415_vm1, %v4323_v6 }
 0xa7d   :  { %v338_v12 = vpop.permute.xlu1 %337 }
 0xa7e   :  { %v4329_v13 = vadd.f32 %v338_v12, %v301_v11 }
 0xa80   :  { %1809 = vrot.lane.b32.xlu0 %v4329_v13, %s3940_s9 }
 0xa81   :  { %v3674_v14 = vpop.permute.xlu1 %3673 }
 0xa82   :  { %v3676_v15 = vunpack.i.h.bf16 %v3674_v14  ;;  %v3675_v23 = vunpack.i.l.bf16 %v3674_v14 }
 0xa84   :  { %v3533_v16 = vpack.c.bf16 %v3676_v15, %v3675_v23 }
 0xa86   :  { %3534 = vmatprep.subr.bf16.mxu1 %v3533_v16 }
 0xa87   :  { %3536 = vmatpush3.bf16.msra.mxu1 %v3533_v16 }
 0xab3   :  { %v1478_v17 = vpop.xlane.xlu0 %1477 }
 0xab4   :  { %3788 = vrcp.f32 %v1478_v17 }
 0xab7   :  { %v1481_v18 = vpop.xlane.xlu0 %1480 }
 0xabb   :  { %v1593_v19 = vpop.xlane.xlu0 %1592 }
 0xabc   :  { %3790 = vrcp.f32 %v1593_v19 }
 0xabd   :  { %3792 = vrcp.f32 %v1481_v18 }
 0xabe   :  { %v3789_v49 = vpop.eup %3788 }
 0xabf   :  { %v3679_v20 = vpop.permute.xlu0 %3678  ;;  %v1484_v40 = vmul.f32 %v3789_v49, %v3781_v43 }
 0xac0   :  { %v3681_v21 = vunpack.i.h.bf16 %v3679_v20  ;;  %v3680_v22 = vunpack.i.l.bf16 %v3679_v20  ;;  %v1596_v26 = vpop.xlane.xlu1 %1595 }
 0xac1   :  { %3794 = vrcp.f32 %v1596_v26 }
 0xac2   :  { %v3543_v27 = vpack.c.bf16 %v3681_v21, %v3680_v22 }
 0xac4   :  { %3545 = vmatprep.subr.msk.bf16.mxu1 %vm4093_vm2, %v3543_v27  ;;  %v3684_v24 = vpop.permute.xlu1 %3683 }
 0xac5   :  { %v3686_v32 = vunpack.i.h.bf16 %v3684_v24  ;;  %v3685_v25 = vunpack.i.l.bf16 %v3684_v24 }
 0xac6   :  { %v3791_v37 = vpop.eup %3790 }
 0xac7   :  { %v3537_v38 = vpack.c.bf16 %v3686_v32, %v3685_v25  ;;  %v1599_v39 = vmul.f32 %v3791_v37, %v3785_v62  ;;  %v3793_v45 = vpop.eup %3792 }
 0xac8   :  { %v1485_v47 = vmul.f32 %v3793_v45, %v3783_v7 }
 0xac9   :  { %3539 = vmatprep.subr.msk.bf16.mxu0 %vm4093_vm2, %v3537_v38  ;;  %v1601_v42 = vmul.f32 %v1599_v39, %v4157_v54 }
 0xaca   :  { %3542 = vmatpush3.bf16.xpose.msk.msra.mxu0 %vm4093_vm2, %v3537_v38 }
 0xacb   :  { %v3795_v46 = vpop.eup %3794  ;;  %3550 = vmatprep.subr.bf16.mxu0 %v3549_v30  ;;  %v1603_v52 = vsub.f32 %v1484_v40, %v1601_v42 }
 0xacc   :  { %v1600_v34 = vmul.f32 %v3795_v46, %v3787_v1 }
 0xacd   :  { %3354 = vmatprep.mubr.msk.f32.mxu1 %vm503_vm5, %v1603_v52 }
 0xace   :  { %v1602_v48 = vmul.f32 %v1600_v34, %v4157_v54 }
 0xad0   :  { %v1604_v50 = vsub.f32 %v1485_v47, %v1602_v48 }
 0xad1   :  { %3362 = vmatmul.mubr.msk.f32.vlgmr.msra.gmra.mrb[18].mxu0 %vm415_vm1, %v4329_v13 }
 0xad2   :  { %3355 = vmatmul.mubr.msk.f32.vlgmr.msra.gmra.mrb[16].mxu1 %vm503_vm5, %v1604_v50  ;;  %3552 = vmatpush3.bf16.msra.mxu0 %v3549_v30 }
 0xad3   :  { %3548 = vmatpush3.bf16.xpose.msk.msra.mxu1 %vm4093_vm2, %v3543_v27 }
 0xaee   :  { %v1808_v56 = vpop.permute.xlu1 %1807 }
 0xaef   :  { %3368 = vmatprep.mubr.msk.f32.mxu1 %vm415_vm1, %v1808_v56 }
 0xaf2   :  { %v1810_v57 = vpop.permute.xlu0 %1809 }
 0xaf3   :  { %3369 = vmatmul.mubr.msk.f32.vlgmr.msra.gmra.mrb[18].mxu1 %vm415_vm1, %v1810_v57 }
 0xba4   :  { %v3363_v29 = vpop.f32.mrb[18].mxu0 }
 0xba5   :  { %v4351_v58 = vpop.f32.mrb[16].mxu1  ;;  %v1774_v10 = vpop.f32.mrb[19].mxu0  ;;  %v1784_v2 = vsel %vm4111_vm3, -inf, %v3363_v29 }
 0xba6   :  { %v4353_v33 = vpop.f32.mrb[17].mxu1  ;;  %v1783_v63 = vsel %vm4116_vm4, -inf, %v1774_v10  ;;  %v1788_v0 = vsel %vm503_vm5, %v1784_v2, -inf }
 0xba7   :  { %v1785_v3 = vsel %vm503_vm5, %v1783_v63, -inf }
 0xbc6   :  { %v3370_v43 = vpop.f32.mrb[18].mxu1 }
 0xbc7   :  { %v1899_v59 = vsel %vm4111_vm3, -inf, %v3370_v43  ;;  %v1889_v7 = vpop.f32.mrb[19].mxu1 }
 0xbc8   :  { %v1898_v61 = vsel %vm4116_vm4, -inf, %v1889_v7  ;;  %v1903_v62 = vsel %vm503_vm5, %v1899_v59, -inf }
 0xbc9   :  { %1904 = vmax.xlane.f32.xlu0 %v1903_v62  ;;  %v1900_v1 = vsel %vm503_vm5, %v1898_v61, -inf }
 0xbca   :  { %1901 = vmax.xlane.f32.xlu1 %v1900_v1 }
 0xbcd   :  { %1786 = vmax.xlane.f32.xlu0 %v1785_v3 }
 0xbce   :  { %1789 = vmax.xlane.f32.xlu1 %v1788_v0 }
 0xc56   :  { %v1905_v4 = vpop.xlane.xlu0 %1904 }
 0xc57   :  { %v1902_v5 = vpop.xlane.xlu1 %1901  ;;  %v1907_v12 = vsub.f32 %v1899_v59, %v1905_v4 }
 0xc58   :  { %v1906_v11 = vsub.f32 %v1898_v61, %v1902_v5 }
 0xc59   :  { %v1910_v19 = vmul.f32 1.442695, %v1907_v12 }
 0xc5a   :  { %v1787_v14 = vpop.xlane.xlu0 %1786  ;;  %v1908_v17 = vmul.f32 1.442695, %v1906_v11 }
 0xc5b   :  { %v1791_v15 = vsub.f32 %v1783_v63, %v1787_v14  ;;  %v1790_v23 = vpop.xlane.xlu1 %1789 }
 0xc5c   :  { %v1792_v16 = vsub.f32 %v1784_v2, %v1790_v23 }
 0xc5d   :  { %v1793_v18 = vmul.f32 1.442695, %v1791_v15 }
 0xc5e   :  { %v1795_v20 = vmul.f32 1.442695, %v1792_v16 }
 0xc5f   :  { %3796 = vpow2.f32 %v1793_v18 }
 0xc60   :  { %3798 = vpow2.f32 %v1795_v20 }
 0xc61   :  { %3800 = vpow2.f32 %v1908_v17 }
 0xc62   :  { %3802 = vpow2.f32 %v1910_v19 }
 0xc69   :  { %v3797_v21 = vpop.eup %3796 }
 0xc6a   :  { %v3799_v22 = vpop.eup %3798  ;;  %v1797_v26 = vsel %vm503_vm5, %v3797_v21, 0.0 }
 0xc6b   :  { %v3801_v27 = vpop.eup %3800  ;;  %1798 = vadd.xlane.f32.xlu0 %v1797_v26  ;;  %v1800_v24 = vsel %vm503_vm5, %v3799_v22, 0.0 }
 0xc6c   :  { %v3803_v49 = vpop.eup %3802  ;;  %1801 = vadd.xlane.f32.xlu1 %v1800_v24  ;;  %v1912_v32 = vsel %vm503_vm5, %v3801_v27, 0.0 }
 0xc6d   :  { %v1915_v25 = vsel %vm503_vm5, %v3803_v49, 0.0 }
 0xc6f   :  { %1913 = vadd.xlane.f32.xlu0 %v1912_v32 }
 0xc70   :  { %1916 = vadd.xlane.f32.xlu1 %v1915_v25 }
 0xc81   :  { %3693 = vrot.lane.b32.xlu1 %v4313_v55, %s3944_s13 }
 0xc85   :  { %3688 = vrot.lane.b32.xlu0 %v4313_v55, %s3941_s10  ;;  %2122 = vrot.lane.b32.xlu1 %v4323_v6, %s3942_s11 }
 0xc89   :  { %2124 = vrot.lane.b32.xlu0 %v4329_v13, %s3942_s11  ;;  %2007 = vrot.lane.b32.xlu1 %v4323_v6, %s3943_s12 }
 0xc8d   :  { %2009 = vrot.lane.b32.xlu0 %v4329_v13, %s3943_s12 }
 0xcf8   :  { %v1799_v37 = vpop.xlane.xlu0 %1798 }
 0xcf9   :  { %v1802_v38 = vpop.xlane.xlu1 %1801  ;;  %3804 = vrcp.f32 %v1799_v37 }
 0xcfa   :  { %3806 = vrcp.f32 %v1802_v38 }
 0xcfc   :  { %v1914_v39 = vpop.xlane.xlu0 %1913 }
 0xcfd   :  { %3808 = vrcp.f32 %v1914_v39  ;;  %v1917_v30 = vpop.xlane.xlu1 %1916 }
 0xcfe   :  { %3810 = vrcp.f32 %v1917_v30 }
 0xd00   :  { %v3689_v40 = vpop.permute.xlu0 %3688 }
 0xd01   :  { %v3691_v42 = vunpack.i.h.bf16 %v3689_v40  ;;  %v3690_v45 = vunpack.i.l.bf16 %v3689_v40  ;;  %v3694_v46 = vpop.permute.xlu1 %3693 }
 0xd02   :  { %v3696_v52 = vunpack.i.h.bf16 %v3694_v46  ;;  %v3695_v34 = vunpack.i.l.bf16 %v3694_v46 }
 0xd03   :  { %v3559_v47 = vpack.c.bf16 %v3691_v42, %v3690_v45  ;;  %v3805_v50 = vpop.eup %3804 }
 0xd04   :  { %v3553_v48 = vpack.c.bf16 %v3696_v52, %v3695_v34  ;;  %v3807_v57 = vpop.eup %3806  ;;  %v2125_v10 = vpop.permute.xlu0 %2124  ;;  %v1805_v62 = vmul.f32 %v3805_v50, %v3797_v21 }
 0xd05   :  { %3561 = vmatprep.subr.msk.bf16.mxu0 %vm4093_vm2, %v3559_v47  ;;  %v2123_v56 = vpop.permute.xlu1 %2122  ;;  %v1806_v1 = vmul.f32 %v3807_v57, %v3799_v22 }
 0xd06   :  { %3555 = vmatprep.subr.msk.bf16.mxu1 %vm4093_vm2, %v3553_v48 }
 0xd07   :  { %v3809_v29 = vpop.eup %3808  ;;  %3558 = vmatpush3.bf16.xpose.msk.msra.mxu1 %vm4093_vm2, %v3553_v48 }
 0xd08   :  { %v3811_v43 = vpop.eup %3810  ;;  %v1920_v59 = vmul.f32 %v3809_v29, %v3801_v27  ;;  %v2010_v0 = vpop.permute.xlu0 %2009  ;;  %v4423_v29 = vpack.i.bf16 %v4302_v28, %v4297_v31 }
 0xd09   :  { %v1921_v7 = vmul.f32 %v3811_v43, %v3803_v49  ;;  %v2008_v61 = vpop.permute.xlu1 %2007 }
 0xd0a   :  { %3382 = vmatprep.mubr.msk.f32.mxu1 %vm415_vm1, %v2008_v61  ;;  %v1922_v63 = vmul.f32 %v1920_v59, %v4157_v54 }
 0xd0b   :  { %v1923_v2 = vmul.f32 %v1921_v7, %v4157_v54 }
 0xd0c   :  { %v1924_v3 = vsub.f32 %v1805_v62, %v1922_v63 }
 0xd0d   :  { %v1925_v4 = vsub.f32 %v1806_v1, %v1923_v2 }
 0xd0e   :  { %3375 = vmatprep.mubr.msk.f32.mxu0 %vm503_vm5, %v1924_v3  ;;  %3383 = vmatmul.mubr.msk.f32.vlgmr.msra.gmra.mrb[20].mxu1 %vm415_vm1, %v2010_v0 }
 0xd0f   :  { %3376 = vmatmul.mubr.msk.f32.vlgmr.msra.gmra.mrb[20].mxu0 %vm503_vm5, %v1925_v4 }
 0xd10   :  { %3564 = vmatpush3.bf16.xpose.msk.msra.mxu0 %vm4093_vm2, %v3559_v47  ;;  %3389 = vmatprep.mubr.msk.f32.mxu0 %vm415_vm1, %v2123_v56 }
 0xd17   :  { %3390 = vmatmul.mubr.msk.f32.vlgmr.msra.gmra.mrb[22].mxu0 %vm415_vm1, %v2125_v10 }
 0xde1   :  { %v3384_v5 = vpop.f32.mrb[20].mxu1 }
 0xde2   :  { %v4399_v11 = vpop.f32.mrb[20].mxu0  ;;  %v2089_v12 = vpop.f32.mrb[21].mxu1  ;;  %v2099_v21 = vsel %vm4111_vm3, -inf, %v3384_v5 }
 0xde3   :  { %v4401_v14 = vpop.f32.mrb[21].mxu0  ;;  %v2098_v19 = vsel %vm4116_vm4, -inf, %v2089_v12  ;;  %v2103_v26 = vsel %vm503_vm5, %v2099_v21, -inf }
 0xde4   :  { %v2100_v22 = vsel %vm503_vm5, %v2098_v19, -inf }
 0xdea   :  { %v3391_v15 = vpop.f32.mrb[22].mxu0 }
 0xdeb   :  { %v2214_v23 = vsel %vm4111_vm3, -inf, %v3391_v15  ;;  %v2204_v16 = vpop.f32.mrb[23].mxu0 }
 0xdec   :  { %v2213_v17 = vsel %vm4116_vm4, -inf, %v2204_v16  ;;  %v2218_v18 = vsel %vm503_vm5, %v2214_v23, -inf }
 0xded   :  { %2219 = vmax.xlane.f32.xlu0 %v2218_v18  ;;  %v2215_v20 = vsel %vm503_vm5, %v2213_v17, -inf }
 0xdee   :  { %2216 = vmax.xlane.f32.xlu1 %v2215_v20 }
 0xdf1   :  { %2101 = vmax.xlane.f32.xlu0 %v2100_v22 }
 0xdf2   :  { %2104 = vmax.xlane.f32.xlu1 %v2103_v26 }
 0xe7a   :  { %v2220_v27 = vpop.xlane.xlu0 %2219 }
 0xe7b   :  { %v2217_v24 = vpop.xlane.xlu1 %2216  ;;  %v2222_v32 = vsub.f32 %v2214_v23, %v2220_v27 }
 0xe7c   :  { %v2221_v49 = vsub.f32 %v2213_v17, %v2217_v24 }
 0xe7d   :  { %v2225_v42 = vmul.f32 1.442695, %v2222_v32 }
 0xe7e   :  { %v2102_v25 = vpop.xlane.xlu0 %2101  ;;  %v2223_v30 = vmul.f32 1.442695, %v2221_v49 }
 0xe7f   :  { %v2106_v37 = vsub.f32 %v2098_v19, %v2102_v25  ;;  %v2105_v38 = vpop.xlane.xlu1 %2104 }
 0xe80   :  { %v2107_v39 = vsub.f32 %v2099_v21, %v2105_v38 }
 0xe81   :  { %v2108_v40 = vmul.f32 1.442695, %v2106_v37 }
 0xe82   :  { %v2110_v45 = vmul.f32 1.442695, %v2107_v39 }
 0xe83   :  { %3812 = vpow2.f32 %v2108_v40 }
 0xe84   :  { %3814 = vpow2.f32 %v2110_v45 }
 0xe85   :  { %3816 = vpow2.f32 %v2223_v30 }
 0xe86   :  { %3818 = vpow2.f32 %v2225_v42 }
 0xe8d   :  { %v3813_v46 = vpop.eup %3812 }
 0xe8e   :  { %v3815_v52 = vpop.eup %3814  ;;  %v2112_v34 = vsel %vm503_vm5, %v3813_v46, 0.0 }
 0xe8f   :  { %v3817_v47 = vpop.eup %3816  ;;  %2113 = vadd.xlane.f32.xlu0 %v2112_v34  ;;  %v2115_v48 = vsel %vm503_vm5, %v3815_v52, 0.0 }
 0xe90   :  { %v3819_v50 = vpop.eup %3818  ;;  %2116 = vadd.xlane.f32.xlu1 %v2115_v48  ;;  %v2227_v56 = vsel %vm503_vm5, %v3817_v47, 0.0 }
 0xe91   :  { %v2230_v57 = vsel %vm503_vm5, %v3819_v50, 0.0 }
 0xe93   :  { %2228 = vadd.xlane.f32.xlu0 %v2227_v56 }
 0xe94   :  { %2231 = vadd.xlane.f32.xlu1 %v2230_v57 }
 0xea5   :  { %3703 = vrot.lane.b32.xlu1 %v4313_v55, %s3932_s29 }
 0xea9   :  { %3708 = vrot.lane.b32.xlu1 %v4313_v55, %s3945_s4  ;;  %3698 = vrot.lane.b32.xlu0 %v4423_v29, %s3943_s12 }
 0xead   :  { %2447 = vrot.lane.b32.xlu1 %v4329_v13, %s3946_s16  ;;  %2445 = vrot.lane.b32.xlu0 %v4323_v6, %s3946_s16 }
 0xeb1   :  { %2332 = vrot.lane.b32.xlu1 %v4329_v13, %s3947_s1  ;;  %2330 = vrot.lane.b32.xlu0 %v4323_v6, %s3947_s1 }
 0xf1c   :  { %v2114_v31 = vpop.xlane.xlu0 %2113 }
 0xf1d   :  { %v2117_v28 = vpop.xlane.xlu1 %2116  ;;  %3820 = vrcp.f32 %v2114_v31 }
 0xf1e   :  { %3822 = vrcp.f32 %v2117_v28 }
 0xf20   :  { %v2229_v10 = vpop.xlane.xlu0 %2228 }
 0xf21   :  { %3824 = vrcp.f32 %v2229_v10  ;;  %v2232_v43 = vpop.xlane.xlu1 %2231 }
 0xf22   :  { %3826 = vrcp.f32 %v2232_v43 }
 0xf24   :  { %v3699_v59 = vpop.permute.xlu0 %3698 }
 0xf25   :  { %v3701_v7 = vunpack.i.h.bf16 %v3699_v59  ;;  %v3700_v61 = vunpack.i.l.bf16 %v3699_v59  ;;  %v3704_v62 = vpop.permute.xlu1 %3703 }
 0xf26   :  { %v3706_v63 = vunpack.i.h.bf16 %v3704_v62  ;;  %v3705_v1 = vunpack.i.l.bf16 %v3704_v62 }
 0xf27   :  { %v3565_v2 = vpack.c.bf16 %v3701_v7, %v3700_v61  ;;  %v3821_v4 = vpop.eup %3820 }
 0xf28   :  { %v3575_v3 = vpack.c.bf16 %v3706_v63, %v3705_v1  ;;  %v2446_v0 = vpop.permute.xlu0 %2445  ;;  %v3823_v12 = vpop.eup %3822  ;;  %v2120_v22 = vmul.f32 %v3821_v4, %v3813_v46 }
 0xf29   :  { %v3709_v5 = vpop.permute.xlu1 %3708  ;;  %3566 = vmatprep.subr.bf16.mxu1 %v3565_v2  ;;  %v2121_v27 = vmul.f32 %v3823_v12, %v3815_v52 }
 0xf2a   :  { %v3711_v15 = vunpack.i.h.bf16 %v3709_v5  ;;  %v3710_v23 = vunpack.i.l.bf16 %v3709_v5  ;;  %3568 = vmatpush3.bf16.msra.mxu1 %v3565_v2 }
 0xf2b   :  { %v3825_v16 = vpop.eup %3824  ;;  %3577 = vmatprep.subr.msk.bf16.mxu1 %vm4093_vm2, %v3575_v3 }
 0xf2c   :  { %v3827_v17 = vpop.eup %3826  ;;  %v3569_v18 = vpack.c.bf16 %v3711_v15, %v3710_v23  ;;  %v2331_v19 = vpop.permute.xlu0 %2330  ;;  %v2235_v20 = vmul.f32 %v3825_v16, %v3817_v47 }
 0xf2d   :  { %v2236_v21 = vmul.f32 %v3827_v17, %v3819_v50  ;;  %3403 = vmatprep.mubr.msk.f32.mxu0 %vm415_vm1, %v2331_v19  ;;  %v2448_v49 = vpop.permute.xlu1 %2447 }
 0xf2e   :  { %3571 = vmatprep.subr.msk.bf16.mxu0 %vm4093_vm2, %v3569_v18  ;;  %v2237_v26 = vmul.f32 %v2235_v20, %v4157_v54 }
 0xf2f   :  { %v2238_v24 = vmul.f32 %v2236_v21, %v4157_v54  ;;  %3574 = vmatpush3.bf16.xpose.msk.msra.mxu0 %vm4093_vm2, %v3569_v18 }
 0xf30   :  { %v2239_v32 = vsub.f32 %v2120_v22, %v2237_v26 }
 0xf31   :  { %v2240_v25 = vsub.f32 %v2121_v27, %v2238_v24  ;;  %v2333_v37 = vpop.permute.xlu1 %2332 }
 0xf32   :  { %3396 = vmatprep.mubr.msk.f32.mxu1 %vm503_vm5, %v2239_v32 }
 0xf33   :  { %3397 = vmatmul.mubr.msk.f32.vlgmr.msra.gmra.mrb[22].mxu1 %vm503_vm5, %v2240_v25 }
 0xf34   :  { %3580 = vmatpush3.bf16.xpose.msk.msra.mxu1 %vm4093_vm2, %v3575_v3  ;;  %3410 = vmatprep.mubr.msk.f32.mxu1 %vm415_vm1, %v2446_v0 }
 0xf36   :  { %3404 = vmatmul.mubr.msk.f32.vlgmr.msra.gmra.mrb[24].mxu0 %vm415_vm1, %v2333_v37 }
 0xf3b   :  { %3411 = vmatmul.mubr.msk.f32.vlgmr.msra.gmra.mrb[24].mxu1 %vm415_vm1, %v2448_v49 }
0x1006   :  { %v4453_v38 = vpop.f32.mrb[22].mxu1 }
0x1007   :  { %v4455_v39 = vpop.f32.mrb[23].mxu1 }
0x1009   :  { %v3405_v30 = vpop.f32.mrb[24].mxu0 }
0x100a   :  { %v2412_v40 = vpop.f32.mrb[25].mxu0  ;;  %v2422_v56 = vsel %vm4111_vm3, -inf, %v3405_v30 }
0x100b   :  { %v2421_v42 = vsel %vm4116_vm4, -inf, %v2412_v40  ;;  %v2426_v57 = vsel %vm503_vm5, %v2422_v56, -inf }
0x100c   :  { %v2423_v45 = vsel %vm503_vm5, %v2421_v42, -inf }
0x100d   :  { %2424 = vmax.xlane.f32.xlu0 %v2423_v45 }
0x100e   :  { %v3412_v46 = vpop.f32.mrb[24].mxu1 }
0x100f   :  { %v2537_v52 = vsel %vm4111_vm3, -inf, %v3412_v46  ;;  %v2527_v34 = vpop.f32.mrb[25].mxu1 }
0x1010   :  { %v2541_v47 = vsel %vm503_vm5, %v2537_v52, -inf  ;;  %v2536_v48 = vsel %vm4116_vm4, -inf, %v2527_v34 }
0x1011   :  { %v2538_v50 = vsel %vm503_vm5, %v2536_v48, -inf  ;;  %2542 = vmax.xlane.f32.xlu1 %v2541_v47 }
0x1012   :  { %2539 = vmax.xlane.f32.xlu0 %v2538_v50 }
0x1016   :  { %2427 = vmax.xlane.f32.xlu0 %v2426_v57 }
0x109a   :  { %v2425_v31 = vpop.xlane.xlu0 %2424 }
0x109b   :  { %v2429_v28 = vsub.f32 %v2421_v42, %v2425_v31 }
0x109d   :  { %v2431_v10 = vmul.f32 1.442695, %v2429_v28 }
0x109e   :  { %v2543_v43 = vpop.xlane.xlu1 %2542 }
0x109f   :  { %3828 = vpow2.f32 %v2431_v10  ;;  %v2540_v59 = vpop.xlane.xlu0 %2539  ;;  %v2545_v7 = vsub.f32 %v2537_v52, %v2543_v43 }
0x10a0   :  { %v2544_v15 = vsub.f32 %v2536_v48, %v2540_v59 }
0x10a1   :  { %v2548_v63 = vmul.f32 1.442695, %v2545_v7 }
0x10a2   :  { %v2546_v23 = vmul.f32 1.442695, %v2544_v15 }
0x10a3   :  { %v2428_v61 = vpop.xlane.xlu0 %2427 }
0x10a4   :  { %v2430_v62 = vsub.f32 %v2422_v56, %v2428_v61 }
0x10a6   :  { %v2433_v1 = vmul.f32 1.442695, %v2430_v62 }
0x10a8   :  { %3830 = vpow2.f32 %v2433_v1 }
0x10a9   :  { %v3829_v2 = vpop.eup %3828  ;;  %3832 = vpow2.f32 %v2548_v63 }
0x10aa   :  { %v2435_v3 = vsel %vm503_vm5, %v3829_v2, 0.0  ;;  %3834 = vpow2.f32 %v2546_v23 }
0x10ab   :  { %2436 = vadd.xlane.f32.xlu1 %v2435_v3 }
0x10b2   :  { %v3831_v0 = vpop.eup %3830 }
0x10b3   :  { %v2438_v4 = vsel %vm503_vm5, %v3831_v0, 0.0  ;;  %v3833_v5 = vpop.eup %3832 }
0x10b4   :  { %2439 = vadd.xlane.f32.xlu0 %v2438_v4  ;;  %v2553_v12 = vsel %vm503_vm5, %v3833_v5, 0.0  ;;  %v3835_v16 = vpop.eup %3834 }
0x10b5   :  { %v2550_v17 = vsel %vm503_vm5, %v3835_v16, 0.0 }
0x10b8   :  { %2554 = vadd.xlane.f32.xlu0 %v2553_v12 }
0x10bc   :  { %3713 = vrot.lane.b32.xlu1 %v4423_v29, %s3947_s1 }
0x10c0   :  { %3723 = vrot.lane.b32.xlu1 %v4313_v55, %s3948_s18 }
0x10ce   :  { %3718 = vrot.lane.b32.xlu0 %v4313_v55, %s3935_s17 }
0x10d2   :  { %2768 = vrot.lane.b32.xlu0 %v4329_v13, %s3949_s19 }
0x10d6   :  { %2653 = vrot.lane.b32.xlu0 %v4329_v13, %s3950_s20 }
0x10e4   :  { %2551 = vadd.xlane.f32.xlu1 %v2550_v17 }
0x10f5   :  { %2766 = vrot.lane.b32.xlu1 %v4323_v6, %s3949_s19 }
0x10f9   :  { %2651 = vrot.lane.b32.xlu1 %v4323_v6, %s3950_s20 }
0x1138   :  { %v2437_v18 = vpop.xlane.xlu1 %2436 }
0x113c   :  { %v3714_v55 = vpop.permute.xlu1 %3713 }
0x113d   :  { %v3716_v19 = vunpack.i.h.bf16 %v3714_v55  ;;  %v3715_v20 = vunpack.i.l.bf16 %v3714_v55 }
0x113f   :  { %v3581_v21 = vpack.c.bf16 %v3716_v19, %v3715_v20 }
0x1140   :  { %v3724_v22 = vpop.permute.xlu1 %3723 }
0x1141   :  { %v3726_v26 = vunpack.i.h.bf16 %v3724_v22  ;;  %v3725_v27 = vunpack.i.l.bf16 %v3724_v22  ;;  %v2440_v24 = vpop.xlane.xlu0 %2439  ;;  %3582 = vmatprep.subr.bf16.mxu0 %v3581_v21 }
0x1142   :  { %3584 = vmatpush3.bf16.msra.mxu0 %v3581_v21 }
0x1143   :  { %v3585_v13 = vpack.c.bf16 %v3726_v26, %v3725_v27 }
0x1145   :  { %v2555_v49 = vpop.xlane.xlu0 %2554  ;;  %3587 = vmatprep.subr.msk.bf16.mxu1 %vm4093_vm2, %v3585_v13 }
0x1146   :  { %3590 = vmatpush3.bf16.xpose.msk.msra.mxu1 %vm4093_vm2, %v3585_v13  ;;  %3836 = vrcp.f32 %v2555_v49 }
0x1147   :  { %3838 = vrcp.f32 %v2437_v18 }
0x1149   :  { %v3719_v6 = vpop.permute.xlu0 %3718 }
0x114a   :  { %v3721_v32 = vunpack.i.h.bf16 %v3719_v6  ;;  %v3720_v25 = vunpack.i.l.bf16 %v3719_v6 }
0x114c   :  { %v3591_v37 = vpack.c.bf16 %v3721_v32, %v3720_v25 }
0x114d   :  { %v2769_v40 = vpop.permute.xlu0 %2768 }
0x114e   :  { %3593 = vmatprep.subr.msk.bf16.mxu0 %vm4093_vm2, %v3591_v37 }
0x1150   :  { %v3837_v45 = vpop.eup %3836 }
0x1151   :  { %v2559_v52 = vmul.f32 %v3837_v45, %v3833_v5  ;;  %v2654_v34 = vpop.permute.xlu0 %2653  ;;  %v3839_v47 = vpop.eup %3838 }
0x1152   :  { %v2443_v31 = vmul.f32 %v3839_v47, %v3829_v2 }
0x1153   :  { %v2561_v57 = vmul.f32 %v2559_v52, %v4157_v54 }
0x1171   :  { %v2552_v30 = vpop.xlane.xlu1 %2551 }
0x1172   :  { %3840 = vrcp.f32 %v2552_v30 }
0x1173   :  { %3842 = vrcp.f32 %v2440_v24 }
0x1175   :  { %v2767_v42 = vpop.permute.xlu1 %2766 }
0x1179   :  { %v2652_v46 = vpop.permute.xlu1 %2651 }
0x117a   :  { %3424 = vmatprep.mubr.msk.f32.mxu1 %vm415_vm1, %v2652_v46 }
0x117b   :  { %3425 = vmatmul.mubr.msk.f32.vlgmr.msra.gmra.mrb[26].mxu1 %vm415_vm1, %v2654_v34 }
0x117c   :  { %v3841_v48 = vpop.eup %3840 }
0x117d   :  { %v3843_v50 = vpop.eup %3842  ;;  %v2558_v56 = vmul.f32 %v3841_v48, %v3835_v16 }
0x117e   :  { %v2444_v10 = vmul.f32 %v3843_v50, %v3831_v0 }
0x117f   :  { %v2560_v28 = vmul.f32 %v2558_v56, %v4157_v54 }
0x1180   :  { %v2563_v59 = vsub.f32 %v2444_v10, %v2561_v57 }
0x1181   :  { %v2562_v43 = vsub.f32 %v2443_v31, %v2560_v28 }
0x1183   :  { %3417 = vmatprep.mubr.msk.f32.mxu0 %vm503_vm5, %v2562_v43 }
0x1184   :  { %3418 = vmatmul.mubr.msk.f32.vlgmr.msra.gmra.mrb[26].mxu0 %vm503_vm5, %v2563_v59 }
0x1185   :  { %3596 = vmatpush3.bf16.xpose.msk.msra.mxu0 %vm4093_vm2, %v3591_v37  ;;  %3431 = vmatprep.mubr.msk.f32.mxu0 %vm415_vm1, %v2767_v42 }
0x118c   :  { %3432 = vmatmul.mubr.msk.f32.vlgmr.msra.gmra.mrb[28].mxu0 %vm415_vm1, %v2769_v40 }
0x124e   :  { %v3426_v7 = vpop.f32.mrb[26].mxu1 }
0x124f   :  { %v2733_v61 = vpop.f32.mrb[27].mxu1  ;;  %v2743_v12 = vsel %vm4111_vm3, -inf, %v3426_v7 }
0x1250   :  { %v2742_v41 = vsel %vm4116_vm4, -inf, %v2733_v61  ;;  %v2747_v23 = vsel %vm503_vm5, %v2743_v12, -inf }
0x1251   :  { %v2744_v15 = vsel %vm503_vm5, %v2742_v41, -inf }
0x1257   :  { %v3419_v62 = vpop.f32.mrb[26].mxu0 }
0x1258   :  { %v2642_v63 = vpop.f32.mrb[27].mxu0 }
0x125f   :  { %v3433_v1 = vpop.f32.mrb[28].mxu0 }
0x1260   :  { %v2858_v2 = vsel %vm4111_vm3, -inf, %v3433_v1  ;;  %v2848_v3 = vpop.f32.mrb[29].mxu0 }
0x1261   :  { %v2862_v0 = vsel %vm503_vm5, %v2858_v2, -inf  ;;  %v2857_v4 = vsel %vm4116_vm4, -inf, %v2848_v3 }
0x1262   :  { %v2859_v5 = vsel %vm503_vm5, %v2857_v4, -inf  ;;  %2863 = vmax.xlane.f32.xlu0 %v2862_v0 }
0x1263   :  { %2860 = vmax.xlane.f32.xlu1 %v2859_v5 }
0x1266   :  { %2745 = vmax.xlane.f32.xlu0 %v2744_v15 }
0x1267   :  { %2748 = vmax.xlane.f32.xlu1 %v2747_v23 }
0x12ef   :  { %v2864_v16 = vpop.xlane.xlu0 %2863 }
0x12f0   :  { %v2866_v17 = vsub.f32 %v2858_v2, %v2864_v16  ;;  %v2861_v18 = vpop.xlane.xlu1 %2860 }
0x12f1   :  { %v2865_v19 = vsub.f32 %v2857_v4, %v2861_v18 }
0x12f2   :  { %v2869_v55 = vmul.f32 1.442695, %v2866_v17 }
0x12f3   :  { %v2746_v53 = vpop.xlane.xlu0 %2745  ;;  %v2867_v26 = vmul.f32 1.442695, %v2865_v19 }
0x12f4   :  { %3844 = vpow2.f32 %v2869_v55  ;;  %v2750_v20 = vsub.f32 %v2742_v41, %v2746_v53  ;;  %v2749_v21 = vpop.xlane.xlu1 %2748 }
0x12f5   :  { %v2751_v22 = vsub.f32 %v2743_v12, %v2749_v21 }
0x12f6   :  { %v2752_v51 = vmul.f32 1.442695, %v2750_v20 }
0x12f7   :  { %v2754_v27 = vmul.f32 1.442695, %v2751_v22 }
0x12f8   :  { %3846 = vpow2.f32 %v2752_v51 }
0x12f9   :  { %3848 = vpow2.f32 %v2754_v27 }
0x12fa   :  { %3850 = vpow2.f32 %v2867_v26 }
0x12fe   :  { %v3845_v24 = vpop.eup %3844 }
0x12ff   :  { %v2874_v13 = vsel %vm503_vm5, %v3845_v24, 0.0 }
0x1300   :  { %2875 = vadd.xlane.f32.xlu1 %v2874_v13 }
0x1302   :  { %v3847_v49 = vpop.eup %3846 }
0x1303   :  { %v3849_v6 = vpop.eup %3848  ;;  %v2756_v32 = vsel %vm503_vm5, %v3847_v49, 0.0 }
0x1304   :  { %v3851_v25 = vpop.eup %3850  ;;  %2757 = vadd.xlane.f32.xlu0 %v2756_v32  ;;  %v2759_v37 = vsel %vm503_vm5, %v3849_v6, 0.0 }
0x1305   :  { %2760 = vadd.xlane.f32.xlu1 %v2759_v37  ;;  %v2871_v30 = vsel %vm503_vm5, %v3851_v25, 0.0 }
0x1308   :  { %2872 = vadd.xlane.f32.xlu0 %v2871_v30 }
0x1316   :  { %2974 = vrot.lane.b32.xlu1 %v4221_v36, %s3948_s18 }
0x131a   :  { %2976 = vrot.lane.b32.xlu1 %v4219_v35, %s3948_s18 }
0x131e   :  { %3728 = vrot.lane.b32.xlu0 %v4423_v29, %s3950_s20  ;;  %2984 = vrot.lane.b32.xlu1 %v4269_v60, %s3945_s4 }
0x1322   :  { %2982 = vrot.lane.b32.xlu0 %v4271_v44, %s3945_s4  ;;  %2992 = vrot.lane.b32.xlu1 %v4351_v58, %s3944_s13 }
0x1326   :  { %2990 = vrot.lane.b32.xlu0 %v4353_v33, %s3944_s13  ;;  %3000 = vrot.lane.b32.xlu1 %v4399_v11, %s3938_s3 }
0x132a   :  { %2998 = vrot.lane.b32.xlu0 %v4401_v14, %s3938_s3  ;;  %3008 = vrot.lane.b32.xlu1 %v4453_v38, %s3950_s20 }
0x132e   :  { %3006 = vrot.lane.b32.xlu0 %v4455_v39, %s3950_s20  ;;  %3016 = vrot.lane.b32.xlu1 %v3419_v62, %s3947_s1 }
0x1332   :  { %3014 = vrot.lane.b32.xlu0 %v2642_v63, %s3947_s1 }
0x138d   :  { %v2876_v35 = vpop.xlane.xlu1 %2875 }
0x138e   :  { %3852 = vrcp.f32 %v2876_v35 }
0x1391   :  { %v2758_v36 = vpop.xlane.xlu0 %2757 }
0x1392   :  { %v2761_v60 = vpop.xlane.xlu1 %2760  ;;  %3854 = vrcp.f32 %v2758_v36 }
0x1393   :  { %3856 = vrcp.f32 %v2761_v60 }
0x1395   :  { %v2873_v44 = vpop.xlane.xlu0 %2872 }
0x1396   :  { %3858 = vrcp.f32 %v2873_v44  ;;  %v2975_v31 = vpop.permute.xlu1 %2974 }
0x1397   :  { %v3028_v2 = vsel %vm503_vm5, %v4177_v9, %v2975_v31 }
0x1398   :  { %v3853_v29 = vpop.eup %3852 }
0x1399   :  { %v3729_v58 = vpop.permute.xlu0 %3728  ;;  %v2880_v42 = vmul.f32 %v3853_v29, %v3845_v24 }
0x139a   :  { %v3731_v33 = vunpack.i.h.bf16 %v3729_v58  ;;  %v3730_v11 = vunpack.i.l.bf16 %v3729_v58  ;;  %v2977_v28 = vpop.permute.xlu1 %2976 }
0x139b   :  { %v2882_v47 = vmul.f32 %v2880_v42, %v4157_v54  ;;  %v3029_v1 = vsel %vm503_vm5, %v4175_v8, %v2977_v28 }
0x139c   :  { %v3597_v14 = vpack.c.bf16 %v3731_v33, %v3730_v11  ;;  %v3855_v38 = vpop.eup %3854 }
0x139d   :  { %v3857_v39 = vpop.eup %3856  ;;  %v2764_v52 = vmul.f32 %v3855_v38, %v3847_v49  ;;  %v2983_v43 = vpop.permute.xlu0 %2982 }
0x139e   :  { %3598 = vmatprep.subr.bf16.mxu1 %v3597_v14  ;;  %v2765_v46 = vmul.f32 %v3857_v39, %v3849_v6  ;;  %v2985_v10 = vpop.permute.xlu1 %2984  ;;  %v3031_v4 = vsel %vm3030_vm6, %v3028_v2, %v2983_v43 }
0x139f   :  { %3600 = vmatpush3.bf16.msra.mxu1 %v3597_v14  ;;  %v3032_v3 = vsel %vm3030_vm6, %v3029_v1, %v2985_v10 }
0x13a0   :  { %v3859_v40 = vpop.eup %3858  ;;  %v2884_v50 = vsub.f32 %v2765_v46, %v2882_v47 }
0x13a1   :  { %v2879_v45 = vmul.f32 %v3859_v40, %v3851_v25  ;;  %v2991_v7 = vpop.permute.xlu0 %2990 }
0x13a2   :  { %v2993_v59 = vpop.permute.xlu1 %2992  ;;  %v3034_v12 = vsel %vm3033_vm7, %v3031_v4, %v2991_v7 }
0x13a3   :  { %v2881_v34 = vmul.f32 %v2879_v45, %v4157_v54  ;;  %v3035_v41 = vsel %vm3033_vm7, %v3032_v3, %v2993_v59 }
0x13a5   :  { %v2883_v48 = vsub.f32 %v2764_v52, %v2881_v34  ;;  %v2999_v54 = vpop.permute.xlu0 %2998 }
0x13a6   :  { %v3001_v61 = vpop.permute.xlu1 %3000  ;;  %v3036_v23 = vsel %vm107_vm0, %v3034_v12, %v2999_v54 }
0x13a7   :  { %3438 = vmatprep.mubr.msk.f32.mxu1 %vm503_vm5, %v2883_v48  ;;  %v3037_v15 = vsel %vm107_vm0, %v3035_v41, %v3001_v61 }
0x13a8   :  { %3439 = vmatmul.mubr.msk.f32.vlgmr.msra.gmra.mrb[28].mxu1 %vm503_vm5, %v2884_v50 }
0x13a9   :  { %v3007_v63 = vpop.permute.xlu0 %3006 }
0x13aa   :  { %v3009_v62 = vpop.permute.xlu1 %3008  ;;  %v3039_v17 = vsel %vm3038_vm8, %v3036_v23, %v3007_v63 }
0x13ab   :  { %v3040_v16 = vsel %vm3038_vm8, %v3037_v15, %v3009_v62 }
0x13ad   :  { %v3015_v5 = vpop.permute.xlu0 %3014 }
0x13ae   :  { %v3017_v0 = vpop.permute.xlu1 %3016  ;;  %v3042_v55 = vsel %vm3041_vm9, %v3039_v17, %v3015_v5 }
0x13af   :  { %v3043_v18 = vsel %vm3041_vm9, %v3040_v16, %v3017_v0 }
0x147b   :  { %v3440_v56 = vpop.f32.mrb[28].mxu1 }
0x147c   :  { %3024 = vrot.lane.b32.xlu1 %v3440_v56, %s3943_s12  ;;  %v2963_v57 = vpop.f32.mrb[29].mxu1 }
0x147d   :  { %3022 = vrot.lane.b32.xlu0 %v2963_v57, %s3943_s12 }
0x14ee   :  { %v3025_v8 = vpop.permute.xlu1 %3024 }
0x14ef   :  { %v3046_v19 = vsel %vm3044_vm10, %v3043_v18, %v3025_v8  ;;  %v3023_v9 = vpop.permute.xlu0 %3022 }
0x14f0   :  { %3048 = vst [vmem:[%s4566_s5 + $0x8] sm:$0xff] %v3046_v19  ;;  %v3045_v53 = vsel %vm3044_vm10, %v3042_v55, %v3023_v9 }
0x14f1   :  { %3047 = vst [vmem:[%s4566_s5] sm:$0xff] %v3045_v53 }
0x14f2   :  { %3053 = vsyncpa [#allocation4], 1 }
0x14f3   :  { %3054 = vsyncpa [#allocation6], 1 }

</bundles_post_ra>
